<compile_context>
chip_gen: v5e
topology: v5e:2x2
jax: 0.10.0
libtpu: 0.0.40
codegen_flags: <defaults>
</compile_context>

<pallas_src>
import functools

import jax
import jax.numpy as jnp
from jax.experimental import pallas as pl
from jax.experimental.pallas import tpu as pltpu


def _round_up(a, m):
    return (a + m - 1) // m * m


def rnn_kernel(x_ref, w_ih_ref, w_hh_ref, b_ref,
               w1_ref, b1_ref, w2_ref, b2_ref, w3_ref, b3_ref,
               out_ref, h_ref, c_ref, *, hidden_pad, t_tile, b_tile):
    """One (batch tile, time tile) grid step of the LSTM + head."""
    Hp = hidden_pad
    t_idx = pl.program_id(1)

    # (Re)initialize recurrent state at the start of each batch tile's T sweep.
    @pl.when(t_idx == 0)
    def _():
        h_ref[...] = jnp.zeros_like(h_ref)
        c_ref[...] = jnp.zeros_like(c_ref)

    # One MXU pass for the whole tile's input contribution + bias.
    # x block rows are ordered (local time step major, local batch minor):
    # row s*b_tile + j  <->  (step s, batch j).
    gx = (jnp.dot(x_ref[...], w_ih_ref[...],
                  preferred_element_type=jnp.float32)
          + b_ref[...])                                  # (t_tile*b_tile, 4*Hp)

    h = h_ref[...]
    c = c_ref[...]
    w_hh = w_hh_ref[...]

    # Statically unrolled recurrence; gate slices are 128-lane aligned
    # because Hp is a multiple of 128. PyTorch gate order: i, f, g, o.
    for s in range(t_tile):
        gates = gx[s * b_tile:(s + 1) * b_tile, :] + jnp.dot(
            h.astype(w_hh.dtype), w_hh, preferred_element_type=jnp.float32)
        i_g = jax.nn.sigmoid(gates[:, 0 * Hp:1 * Hp])
        f_g = jax.nn.sigmoid(gates[:, 1 * Hp:2 * Hp])
        g_g = jnp.tanh(gates[:, 2 * Hp:3 * Hp])
        o_g = jax.nn.sigmoid(gates[:, 3 * Hp:4 * Hp])
        c = f_g * c + i_g * g_g
        h = o_g * jnp.tanh(c)

    h_ref[...] = h
    c_ref[...] = c

    # MLP head only after the final time tile; output is lane-dense padded.
    @pl.when(t_idx == pl.num_programs(1) - 1)
    def _():
        z1 = jnp.maximum(
            jnp.dot(h, w1_ref[...], preferred_element_type=jnp.float32)
            + b1_ref[...], 0.0)
        z2 = jnp.maximum(
            jnp.dot(z1, w2_ref[...], preferred_element_type=jnp.float32)
            + b2_ref[...], 0.0)
        z3 = jnp.tanh(
            jnp.dot(z2, w3_ref[...], preferred_element_type=jnp.float32)
            + b3_ref[...])
        out_ref[...] = z3.astype(out_ref.dtype)


def _pad_gate_cols(w, H, Hp):
    """(rows, 4*H) -> (rows, 4*Hp): each gate block zero-padded to Hp lanes."""
    out = jnp.zeros((w.shape[0], 4 * Hp), w.dtype)
    for k in range(4):
        out = out.at[:, k * Hp:k * Hp + H].set(w[:, k * H:(k + 1) * H])
    return out


def _pad_2d(w, rows, cols):
    out = jnp.zeros((rows, cols), w.dtype)
    return out.at[:w.shape[0], :w.shape[1]].set(w)


def rnn_forward(x, params, *, compute_dtype=jnp.float32, t_tile=4):
    """x: (B, T, D) batch-first, like the PyTorch module. Returns (B, out)."""
    B, T, D = x.shape
    H = params["w_hh"].shape[0]
    F1 = params["w1"].shape[1]
    F2 = params["w2"].shape[1]
    out_size = params["w3"].shape[1]

    Hp = _round_up(H, 128)
    F1p = _round_up(F1, 128)
    F2p = _round_up(F2, 128)
    OUTp = _round_up(out_size, 128)

    # Batch padding / tiling (sublane-align; tile at 128 rows for big batches).
    B_pad = _round_up(B, 8)
    if B_pad >= 128:
        B_pad = _round_up(B_pad, 128)
        b_tile = 128
    else:
        b_tile = B_pad
    grid_b = B_pad // b_tile

    # Time tiling (state carried in VMEM scratch across tiles).
    if T % t_tile != 0:
        t_tile = max(d for d in range(1, t_tile + 1) if T % d == 0)
    grid_t = T // t_tile

    # --- wrapper-side layout plumbing (one-time relayout, plain XLA ops) ---
    # TODO(synk): in production, produce x upstream already in this blocked
    # time-major layout to avoid the extra HBM pass.
    xp = jnp.zeros((B_pad, T, D), x.dtype).at[:B].set(x)
    x_blk = (xp.reshape(grid_b, b_tile, grid_t, t_tile, D)
               .transpose(0, 2, 3, 1, 4)
               .reshape(grid_b, grid_t, t_tile * b_tile, D)
               .astype(compute_dtype))

    # Pad weights: per-gate columns to 128-lane blocks; zeros elsewhere keep
    # the padded hidden lanes at exactly 0 through the recurrence.
    w_ih_p = _pad_gate_cols(params["w_ih"], H, Hp).astype(compute_dtype)
    w_hh_p = _pad_2d(_pad_gate_cols(params["w_hh"], H, Hp),
                     Hp, 4 * Hp).astype(compute_dtype)
    b_p = _pad_gate_cols(params["b"], H, Hp).astype(jnp.float32)
    w1_p = _pad_2d(params["w1"], Hp, F1p).astype(jnp.float32)
    b1_p = _pad_2d(params["b1"], 1, F1p).astype(jnp.float32)
    w2_p = _pad_2d(params["w2"], F1p, F2p).astype(jnp.float32)
    b2_p = _pad_2d(params["b2"], 1, F2p).astype(jnp.float32)
    w3_p = _pad_2d(params["w3"], F2p, OUTp).astype(jnp.float32)
    b3_p = _pad_2d(params["b3"], 1, OUTp).astype(jnp.float32)

    kernel = functools.partial(rnn_kernel, hidden_pad=Hp,
                               t_tile=t_tile, b_tile=b_tile)
    const = lambda b, t: (0, 0)
    out = pl.pallas_call(
        kernel,
        out_shape=jax.ShapeDtypeStruct((B_pad, OUTp), jnp.float32),
        grid=(grid_b, grid_t),
        in_specs=[
            pl.BlockSpec((None, None, t_tile * b_tile, D),
                         lambda b, t: (b, t, 0, 0)),       # streamed x tiles
            pl.BlockSpec((D, 4 * Hp), const),               # W_ih (resident)
            pl.BlockSpec((Hp, 4 * Hp), const),              # W_hh (resident)
            pl.BlockSpec((1, 4 * Hp), const),               # bias
            pl.BlockSpec((Hp, F1p), const),                 # fc1 W
            pl.BlockSpec((1, F1p), const),                  # fc1 b
            pl.BlockSpec((F1p, F2p), const),                # fc2 W
            pl.BlockSpec((1, F2p), const),                  # fc2 b
            pl.BlockSpec((F2p, OUTp), const),               # fc3 W
            pl.BlockSpec((1, OUTp), const),                 # fc3 b
        ],
        out_specs=pl.BlockSpec((b_tile, OUTp), lambda b, t: (b, 0)),
        scratch_shapes=[pltpu.VMEM((b_tile, Hp), jnp.float32),   # h carry
                        pltpu.VMEM((b_tile, Hp), jnp.float32)],  # c carry
        compiler_params=pltpu.CompilerParams(
            dimension_semantics=("parallel", "arbitrary"),
            vmem_limit_bytes=32 * 1024 * 1024),
    )(x_blk, w_ih_p, w_hh_p, b_p, w1_p, b1_p, w2_p, b2_p, w3_p, b3_p)
    return out[:B, :out_size]


def init_params(key, input_size, hidden_size, output_size):
    """Deterministic init mimicking PyTorch's uniform(-1/sqrt(fan), 1/sqrt(fan))."""
    ks = jax.random.split(key, 12)
    H = hidden_size

    def u(k, shape, fan):
        bound = 1.0 / jnp.sqrt(fan)
        return jax.random.uniform(k, shape, jnp.float32, -bound, bound)

    w_ih = u(ks[0], (4 * H, input_size), H)       # PyTorch weight_ih_l0
    w_hh = u(ks[1], (4 * H, H), H)                # PyTorch weight_hh_l0
    b_ih = u(ks[2], (4 * H,), H)
    b_hh = u(ks[3], (4 * H,), H)
    w1 = u(ks[4], (64, H), H)                     # fc1.weight
    b1 = u(ks[5], (64,), H)
    w2 = u(ks[6], (32, 64), 64)                   # fc2.weight
    b2 = u(ks[7], (32,), 64)
    w3 = u(ks[8], (output_size, 32), 32)          # fc3.weight
    b3 = u(ks[9], (output_size,), 32)

    # Kernel storage layout: (in_features, out_features); biases as (1, out).
    return {
        "w_ih": w_ih.T,                           # (D, 4H)
        "w_hh": w_hh.T,                           # (H, 4H)
        "b": (b_ih + b_hh)[None, :],              # (1, 4H)
        "w1": w1.T, "b1": b1[None, :],            # (H, 64), (1, 64)
        "w2": w2.T, "b2": b2[None, :],            # (64, 32), (1, 32)
        "w3": w3.T, "b3": b3[None, :],            # (32, out), (1, out)
    }


def rnn_forward_ref(x, params):
    """Pure-JAX reference of the same forward pass (for correctness check)."""
    B, T, D = x.shape
    H = params["w_hh"].shape[0]
    h = jnp.zeros((B, H), jnp.float32)
    c = jnp.zeros((B, H), jnp.float32)
    for t in range(T):
        gates = x[:, t, :] @ params["w_ih"] + h @ params["w_hh"] + params["b"]
        i = jax.nn.sigmoid(gates[:, 0 * H:1 * H])
        f = jax.nn.sigmoid(gates[:, 1 * H:2 * H])
        g = jnp.tanh(gates[:, 2 * H:3 * H])
        o = jax.nn.sigmoid(gates[:, 3 * H:4 * H])
        c = f * c + i * g
        h = o * jnp.tanh(c)
    z1 = jnp.maximum(h @ params["w1"] + params["b1"], 0.0)
    z2 = jnp.maximum(z1 @ params["w2"] + params["b2"], 0.0)
    return jnp.tanh(z2 @ params["w3"] + params["b3"])


if __name__ == "__main__":
    B, T = 2, 8
    input_size, hidden_size, output_size = 8, 32, 4

    key = jax.random.PRNGKey(0)
    kx, kp = jax.random.split(key)
    x = jax.random.normal(kx, (B, T, input_size), jnp.float32)
    params = init_params(kp, input_size, hidden_size, output_size)

    ref = rnn_forward_ref(x, params)

    # f32 path: exact match against the reference.
    out = jax.block_until_ready(rnn_forward(x, params))
    assert out.shape == (B, output_size)
    assert jnp.allclose(out, ref, atol=1e-4, rtol=1e-4), (out, ref)

    # bf16 MXU-operand path (production setting for v6e/v7x): loose check.
    out_bf16 = jax.block_until_ready(
        rnn_forward(x, params, compute_dtype=jnp.bfloat16))
    assert out_bf16.shape == (B, output_size)
    assert jnp.all(jnp.isfinite(out_bf16))
    assert jnp.allclose(out_bf16, ref, atol=0.1), (out_bf16, ref)

    print("KERNEL_OK")
</pallas_src>

<mosaic_0001>
module attributes {stable_mosaic.version = 11 : i64} {
  func.func @rnn_kernel(%arg0: i32, %arg1: i32, %arg2: memref<1x1x32x8xf32, #tpu.memory_space<vmem>>, %arg3: memref<8x512xf32, #tpu.memory_space<vmem>>, %arg4: memref<128x512xf32, #tpu.memory_space<vmem>>, %arg5: memref<1x512xf32, #tpu.memory_space<vmem>>, %arg6: memref<128x128xf32, #tpu.memory_space<vmem>>, %arg7: memref<1x128xf32, #tpu.memory_space<vmem>>, %arg8: memref<128x128xf32, #tpu.memory_space<vmem>>, %arg9: memref<1x128xf32, #tpu.memory_space<vmem>>, %arg10: memref<128x128xf32, #tpu.memory_space<vmem>>, %arg11: memref<1x128xf32, #tpu.memory_space<vmem>>, %arg12: memref<8x128xf32, #tpu.memory_space<vmem>>, %arg13: memref<8x128xf32, #tpu.memory_space<vmem>>, %arg14: memref<8x128xf32, #tpu.memory_space<vmem>>) attributes {dimension_semantics = [#tpu.dimension_semantics<parallel>, #tpu.dimension_semantics<arbitrary>], iteration_bounds = array<i64: 1, 2>, scalar_prefetch = 0 : i64, scratch_operands = 2 : i64, tpu.core_type = #tpu.core_type<tc>, window_params = [{transform_indices = @transform_0, window_bounds = array<i64: 1, 1, 32, 8>}, {pipeline_mode = #tpu.pipeline_mode<synchronous>, transform_indices = @transform_1, window_bounds = array<i64: 8, 512>}, {pipeline_mode = #tpu.pipeline_mode<synchronous>, transform_indices = @transform_2, window_bounds = array<i64: 128, 512>}, {pipeline_mode = #tpu.pipeline_mode<synchronous>, transform_indices = @transform_3, window_bounds = array<i64: 1, 512>}, {pipeline_mode = #tpu.pipeline_mode<synchronous>, transform_indices = @transform_4, window_bounds = array<i64: 128, 128>}, {pipeline_mode = #tpu.pipeline_mode<synchronous>, transform_indices = @transform_5, window_bounds = array<i64: 1, 128>}, {pipeline_mode = #tpu.pipeline_mode<synchronous>, transform_indices = @transform_6, window_bounds = array<i64: 128, 128>}, {pipeline_mode = #tpu.pipeline_mode<synchronous>, transform_indices = @transform_7, window_bounds = array<i64: 1, 128>}, {pipeline_mode = #tpu.pipeline_mode<synchronous>, transform_indices = @transform_8, window_bounds = array<i64: 128, 128>}, {pipeline_mode = #tpu.pipeline_mode<synchronous>, transform_indices = @transform_9, window_bounds = array<i64: 1, 128>}, {transform_indices = @transform_10, window_bounds = array<i64: 8, 128>}]} {
    %c0_i32 = arith.constant 0 : i32
    %0 = arith.cmpi eq, %arg1, %c0_i32 : i32
    %1 = arith.extui %0 : i1 to i32
    %c0_i32_0 = arith.constant 0 : i32
    %2 = arith.cmpi ne, %1, %c0_i32_0 : i32
    scf.if %2 {
      %cst_35 = arith.constant 0.000000e+00 : f32
      %130 = vector.broadcast %cst_35 : f32 to vector<8x128xf32>
      %c0_36 = arith.constant 0 : index
      %c0_37 = arith.constant 0 : index
      %131 = vector.load %arg13[%c0_36, %c0_37] : memref<8x128xf32, #tpu.memory_space<vmem>>, vector<8x128xf32>
      tpu.vector_store %arg13[%c0_36, %c0_37], %130 {strides = array<i32>} : memref<8x128xf32, #tpu.memory_space<vmem>>, vector<8x128xf32>,
      %cst_38 = arith.constant 0.000000e+00 : f32
      %132 = vector.broadcast %cst_38 : f32 to vector<8x128xf32>
      %c0_39 = arith.constant 0 : index
      %c0_40 = arith.constant 0 : index
      %133 = vector.load %arg14[%c0_39, %c0_40] : memref<8x128xf32, #tpu.memory_space<vmem>>, vector<8x128xf32>
      tpu.vector_store %arg14[%c0_39, %c0_40], %132 {strides = array<i32>} : memref<8x128xf32, #tpu.memory_space<vmem>>, vector<8x128xf32>,
    } else {
    }
    %c0 = arith.constant 0 : index
    %c0_1 = arith.constant 0 : index
    %c0_2 = arith.constant 0 : index
    %c0_3 = arith.constant 0 : index
    %3 = vector.load %arg2[%c0, %c0_1, %c0_2, %c0_3] : memref<1x1x32x8xf32, #tpu.memory_space<vmem>>, vector<1x1x32x8xf32>
    %4 = vector.shape_cast %3 : vector<1x1x32x8xf32> to vector<32x8xf32>
    %c0_4 = arith.constant 0 : index
    %c0_5 = arith.constant 0 : index
    %5 = vector.load %arg3[%c0_4, %c0_5] : memref<8x512xf32, #tpu.memory_space<vmem>>, vector<8x512xf32>
    %cst = arith.constant dense<0.000000e+00> : vector<32x512xf32>
    %6 = tpu.matmul %4, %5, %cst {dimension_numbers = #tpu.dot_dimension_numbers<[1], [0], [0], [1], [0, 0, 1, 1], [], []>} : vector<32x8xf32>, vector<8x512xf32>, vector<32x512xf32> -> vector<32x512xf32>
    %c0_6 = arith.constant 0 : index
    %c0_7 = arith.constant 0 : index
    %7 = vector.load %arg5[%c0_6, %c0_7] : memref<1x512xf32, #tpu.memory_space<vmem>>, vector<1x512xf32>
    %8 = vector.broadcast %7 : vector<1x512xf32> to vector<32x512xf32>
    %9 = arith.addf %6, %8 : vector<32x512xf32>
    %c0_8 = arith.constant 0 : index
    %c0_9 = arith.constant 0 : index
    %10 = vector.load %arg13[%c0_8, %c0_9] : memref<8x128xf32, #tpu.memory_space<vmem>>, vector<8x128xf32>
    %c0_10 = arith.constant 0 : index
    %c0_11 = arith.constant 0 : index
    %11 = vector.load %arg14[%c0_10, %c0_11] : memref<8x128xf32, #tpu.memory_space<vmem>>, vector<8x128xf32>
    %c0_12 = arith.constant 0 : index
    %c0_13 = arith.constant 0 : index
    %12 = vector.load %arg4[%c0_12, %c0_13] : memref<128x512xf32, #tpu.memory_space<vmem>>, vector<128x512xf32>
    %13 = vector.extract_strided_slice %9 {offsets = [0, 0], sizes = [8, 512], strides = [1, 1]} : vector<32x512xf32> to vector<8x512xf32>
    %cst_14 = arith.constant dense<0.000000e+00> : vector<8x512xf32>
    %14 = tpu.matmul %10, %12, %cst_14 {dimension_numbers = #tpu.dot_dimension_numbers<[1], [0], [0], [1], [0, 0, 1, 1], [], []>} : vector<8x128xf32>, vector<128x512xf32>, vector<8x512xf32> -> vector<8x512xf32>
    %15 = arith.addf %13, %14 : vector<8x512xf32>
    %16 = vector.extract_strided_slice %15 {offsets = [0, 0], sizes = [8, 128], strides = [1, 1]} : vector<8x512xf32> to vector<8x128xf32>
    %17 = arith.negf %16 : vector<8x128xf32>
    %18 = math.exp %17 : vector<8x128xf32>
    %cst_15 = arith.constant 1.000000e+00 : f32
    %19 = vector.broadcast %cst_15 : f32 to vector<8x128xf32>
    %20 = arith.addf %19, %18 : vector<8x128xf32>
    %21 = arith.divf %19, %20 : vector<8x128xf32>
    %22 = vector.extract_strided_slice %15 {offsets = [0, 128], sizes = [8, 128], strides = [1, 1]} : vector<8x512xf32> to vector<8x128xf32>
    %23 = arith.negf %22 : vector<8x128xf32>
    %24 = math.exp %23 : vector<8x128xf32>
    %cst_16 = arith.constant 1.000000e+00 : f32
    %25 = vector.broadcast %cst_16 : f32 to vector<8x128xf32>
    %26 = arith.addf %25, %24 : vector<8x128xf32>
    %27 = arith.divf %25, %26 : vector<8x128xf32>
    %28 = vector.extract_strided_slice %15 {offsets = [0, 256], sizes = [8, 128], strides = [1, 1]} : vector<8x512xf32> to vector<8x128xf32>
    %29 = math.tanh %28 : vector<8x128xf32>
    %30 = vector.extract_strided_slice %15 {offsets = [0, 384], sizes = [8, 128], strides = [1, 1]} : vector<8x512xf32> to vector<8x128xf32>
    %31 = arith.negf %30 : vector<8x128xf32>
    %32 = math.exp %31 : vector<8x128xf32>
    %cst_17 = arith.constant 1.000000e+00 : f32
    %33 = vector.broadcast %cst_17 : f32 to vector<8x128xf32>
    %34 = arith.addf %33, %32 : vector<8x128xf32>
    %35 = arith.divf %33, %34 : vector<8x128xf32>
    %36 = arith.mulf %27, %11 : vector<8x128xf32>
    %37 = arith.mulf %21, %29 : vector<8x128xf32>
    %38 = arith.addf %36, %37 : vector<8x128xf32>
    %39 = math.tanh %38 : vector<8x128xf32>
    %40 = arith.mulf %35, %39 : vector<8x128xf32>
    %41 = vector.extract_strided_slice %9 {offsets = [8, 0], sizes = [8, 512], strides = [1, 1]} : vector<32x512xf32> to vector<8x512xf32>
    %cst_18 = arith.constant dense<0.000000e+00> : vector<8x512xf32>
    %42 = tpu.matmul %40, %12, %cst_18 {dimension_numbers = #tpu.dot_dimension_numbers<[1], [0], [0], [1], [0, 0, 1, 1], [], []>} : vector<8x128xf32>, vector<128x512xf32>, vector<8x512xf32> -> vector<8x512xf32>
    %43 = arith.addf %41, %42 : vector<8x512xf32>
    %44 = vector.extract_strided_slice %43 {offsets = [0, 0], sizes = [8, 128], strides = [1, 1]} : vector<8x512xf32> to vector<8x128xf32>
    %45 = arith.negf %44 : vector<8x128xf32>
    %46 = math.exp %45 : vector<8x128xf32>
    %cst_19 = arith.constant 1.000000e+00 : f32
    %47 = vector.broadcast %cst_19 : f32 to vector<8x128xf32>
    %48 = arith.addf %47, %46 : vector<8x128xf32>
    %49 = arith.divf %47, %48 : vector<8x128xf32>
    %50 = vector.extract_strided_slice %43 {offsets = [0, 128], sizes = [8, 128], strides = [1, 1]} : vector<8x512xf32> to vector<8x128xf32>
    %51 = arith.negf %50 : vector<8x128xf32>
    %52 = math.exp %51 : vector<8x128xf32>
    %cst_20 = arith.constant 1.000000e+00 : f32
    %53 = vector.broadcast %cst_20 : f32 to vector<8x128xf32>
    %54 = arith.addf %53, %52 : vector<8x128xf32>
    %55 = arith.divf %53, %54 : vector<8x128xf32>
    %56 = vector.extract_strided_slice %43 {offsets = [0, 256], sizes = [8, 128], strides = [1, 1]} : vector<8x512xf32> to vector<8x128xf32>
    %57 = math.tanh %56 : vector<8x128xf32>
    %58 = vector.extract_strided_slice %43 {offsets = [0, 384], sizes = [8, 128], strides = [1, 1]} : vector<8x512xf32> to vector<8x128xf32>
    %59 = arith.negf %58 : vector<8x128xf32>
    %60 = math.exp %59 : vector<8x128xf32>
    %cst_21 = arith.constant 1.000000e+00 : f32
    %61 = vector.broadcast %cst_21 : f32 to vector<8x128xf32>
    %62 = arith.addf %61, %60 : vector<8x128xf32>
    %63 = arith.divf %61, %62 : vector<8x128xf32>
    %64 = arith.mulf %55, %38 : vector<8x128xf32>
    %65 = arith.mulf %49, %57 : vector<8x128xf32>
    %66 = arith.addf %64, %65 : vector<8x128xf32>
    %67 = math.tanh %66 : vector<8x128xf32>
    %68 = arith.mulf %63, %67 : vector<8x128xf32>
    %69 = vector.extract_strided_slice %9 {offsets = [16, 0], sizes = [8, 512], strides = [1, 1]} : vector<32x512xf32> to vector<8x512xf32>
    %cst_22 = arith.constant dense<0.000000e+00> : vector<8x512xf32>
    %70 = tpu.matmul %68, %12, %cst_22 {dimension_numbers = #tpu.dot_dimension_numbers<[1], [0], [0], [1], [0, 0, 1, 1], [], []>} : vector<8x128xf32>, vector<128x512xf32>, vector<8x512xf32> -> vector<8x512xf32>
    %71 = arith.addf %69, %70 : vector<8x512xf32>
    %72 = vector.extract_strided_slice %71 {offsets = [0, 0], sizes = [8, 128], strides = [1, 1]} : vector<8x512xf32> to vector<8x128xf32>
    %73 = arith.negf %72 : vector<8x128xf32>
    %74 = math.exp %73 : vector<8x128xf32>
    %cst_23 = arith.constant 1.000000e+00 : f32
    %75 = vector.broadcast %cst_23 : f32 to vector<8x128xf32>
    %76 = arith.addf %75, %74 : vector<8x128xf32>
    %77 = arith.divf %75, %76 : vector<8x128xf32>
    %78 = vector.extract_strided_slice %71 {offsets = [0, 128], sizes = [8, 128], strides = [1, 1]} : vector<8x512xf32> to vector<8x128xf32>
    %79 = arith.negf %78 : vector<8x128xf32>
    %80 = math.exp %79 : vector<8x128xf32>
    %cst_24 = arith.constant 1.000000e+00 : f32
    %81 = vector.broadcast %cst_24 : f32 to vector<8x128xf32>
    %82 = arith.addf %81, %80 : vector<8x128xf32>
    %83 = arith.divf %81, %82 : vector<8x128xf32>
    %84 = vector.extract_strided_slice %71 {offsets = [0, 256], sizes = [8, 128], strides = [1, 1]} : vector<8x512xf32> to vector<8x128xf32>
    %85 = math.tanh %84 : vector<8x128xf32>
    %86 = vector.extract_strided_slice %71 {offsets = [0, 384], sizes = [8, 128], strides = [1, 1]} : vector<8x512xf32> to vector<8x128xf32>
    %87 = arith.negf %86 : vector<8x128xf32>
    %88 = math.exp %87 : vector<8x128xf32>
    %cst_25 = arith.constant 1.000000e+00 : f32
    %89 = vector.broadcast %cst_25 : f32 to vector<8x128xf32>
    %90 = arith.addf %89, %88 : vector<8x128xf32>
    %91 = arith.divf %89, %90 : vector<8x128xf32>
    %92 = arith.mulf %83, %66 : vector<8x128xf32>
    %93 = arith.mulf %77, %85 : vector<8x128xf32>
    %94 = arith.addf %92, %93 : vector<8x128xf32>
    %95 = math.tanh %94 : vector<8x128xf32>
    %96 = arith.mulf %91, %95 : vector<8x128xf32>
    %97 = vector.extract_strided_slice %9 {offsets = [24, 0], sizes = [8, 512], strides = [1, 1]} : vector<32x512xf32> to vector<8x512xf32>
    %cst_26 = arith.constant dense<0.000000e+00> : vector<8x512xf32>
    %98 = tpu.matmul %96, %12, %cst_26 {dimension_numbers = #tpu.dot_dimension_numbers<[1], [0], [0], [1], [0, 0, 1, 1], [], []>} : vector<8x128xf32>, vector<128x512xf32>, vector<8x512xf32> -> vector<8x512xf32>
    %99 = arith.addf %97, %98 : vector<8x512xf32>
    %100 = vector.extract_strided_slice %99 {offsets = [0, 0], sizes = [8, 128], strides = [1, 1]} : vector<8x512xf32> to vector<8x128xf32>
    %101 = arith.negf %100 : vector<8x128xf32>
    %102 = math.exp %101 : vector<8x128xf32>
    %cst_27 = arith.constant 1.000000e+00 : f32
    %103 = vector.broadcast %cst_27 : f32 to vector<8x128xf32>
    %104 = arith.addf %103, %102 : vector<8x128xf32>
    %105 = arith.divf %103, %104 : vector<8x128xf32>
    %106 = vector.extract_strided_slice %99 {offsets = [0, 128], sizes = [8, 128], strides = [1, 1]} : vector<8x512xf32> to vector<8x128xf32>
    %107 = arith.negf %106 : vector<8x128xf32>
    %108 = math.exp %107 : vector<8x128xf32>
    %cst_28 = arith.constant 1.000000e+00 : f32
    %109 = vector.broadcast %cst_28 : f32 to vector<8x128xf32>
    %110 = arith.addf %109, %108 : vector<8x128xf32>
    %111 = arith.divf %109, %110 : vector<8x128xf32>
    %112 = vector.extract_strided_slice %99 {offsets = [0, 256], sizes = [8, 128], strides = [1, 1]} : vector<8x512xf32> to vector<8x128xf32>
    %113 = math.tanh %112 : vector<8x128xf32>
    %114 = vector.extract_strided_slice %99 {offsets = [0, 384], sizes = [8, 128], strides = [1, 1]} : vector<8x512xf32> to vector<8x128xf32>
    %115 = arith.negf %114 : vector<8x128xf32>
    %116 = math.exp %115 : vector<8x128xf32>
    %cst_29 = arith.constant 1.000000e+00 : f32
    %117 = vector.broadcast %cst_29 : f32 to vector<8x128xf32>
    %118 = arith.addf %117, %116 : vector<8x128xf32>
    %119 = arith.divf %117, %118 : vector<8x128xf32>
    %120 = arith.mulf %111, %94 : vector<8x128xf32>
    %121 = arith.mulf %105, %113 : vector<8x128xf32>
    %122 = arith.addf %120, %121 : vector<8x128xf32>
    %123 = math.tanh %122 : vector<8x128xf32>
    %124 = arith.mulf %119, %123 : vector<8x128xf32>
    %c0_30 = arith.constant 0 : index
    %c0_31 = arith.constant 0 : index
    %125 = vector.load %arg13[%c0_30, %c0_31] : memref<8x128xf32, #tpu.memory_space<vmem>>, vector<8x128xf32>
    tpu.vector_store %arg13[%c0_30, %c0_31], %124 {strides = array<i32>} : memref<8x128xf32, #tpu.memory_space<vmem>>, vector<8x128xf32>,
    %c0_32 = arith.constant 0 : index
    %c0_33 = arith.constant 0 : index
    %126 = vector.load %arg14[%c0_32, %c0_33] : memref<8x128xf32, #tpu.memory_space<vmem>>, vector<8x128xf32>
    tpu.vector_store %arg14[%c0_32, %c0_33], %122 {strides = array<i32>} : memref<8x128xf32, #tpu.memory_space<vmem>>, vector<8x128xf32>,
    %c1_i32 = arith.constant 1 : i32
    %127 = arith.cmpi eq, %arg1, %c1_i32 : i32
    %128 = arith.extui %127 : i1 to i32
    %c0_i32_34 = arith.constant 0 : i32
    %129 = arith.cmpi ne, %128, %c0_i32_34 : i32
    scf.if %129 {
      %c0_35 = arith.constant 0 : index
      %c0_36 = arith.constant 0 : index
      %130 = vector.load %arg6[%c0_35, %c0_36] : memref<128x128xf32, #tpu.memory_space<vmem>>, vector<128x128xf32>
      %cst_37 = arith.constant dense<0.000000e+00> : vector<8x128xf32>
      %131 = tpu.matmul %124, %130, %cst_37 {dimension_numbers = #tpu.dot_dimension_numbers<[1], [0], [0], [1], [0, 0, 1, 1], [], []>} : vector<8x128xf32>, vector<128x128xf32>, vector<8x128xf32> -> vector<8x128xf32>
      %c0_38 = arith.constant 0 : index
      %c0_39 = arith.constant 0 : index
      %132 = vector.load %arg7[%c0_38, %c0_39] : memref<1x128xf32, #tpu.memory_space<vmem>>, vector<1x128xf32>
      %133 = vector.broadcast %132 : vector<1x128xf32> to vector<8x128xf32>
      %134 = arith.addf %131, %133 : vector<8x128xf32>
      %cst_40 = arith.constant 0.000000e+00 : f32
      %135 = vector.broadcast %cst_40 : f32 to vector<8x128xf32>
      %136 = arith.maximumf %134, %135 : vector<8x128xf32>
      %c0_41 = arith.constant 0 : index
      %c0_42 = arith.constant 0 : index
      %137 = vector.load %arg8[%c0_41, %c0_42] : memref<128x128xf32, #tpu.memory_space<vmem>>, vector<128x128xf32>
      %cst_43 = arith.constant dense<0.000000e+00> : vector<8x128xf32>
      %138 = tpu.matmul %136, %137, %cst_43 {dimension_numbers = #tpu.dot_dimension_numbers<[1], [0], [0], [1], [0, 0, 1, 1], [], []>} : vector<8x128xf32>, vector<128x128xf32>, vector<8x128xf32> -> vector<8x128xf32>
      %c0_44 = arith.constant 0 : index
      %c0_45 = arith.constant 0 : index
      %139 = vector.load %arg9[%c0_44, %c0_45] : memref<1x128xf32, #tpu.memory_space<vmem>>, vector<1x128xf32>
      %140 = vector.broadcast %139 : vector<1x128xf32> to vector<8x128xf32>
      %141 = arith.addf %138, %140 : vector<8x128xf32>
      %cst_46 = arith.constant 0.000000e+00 : f32
      %142 = vector.broadcast %cst_46 : f32 to vector<8x128xf32>
      %143 = arith.maximumf %141, %142 : vector<8x128xf32>
      %c0_47 = arith.constant 0 : index
      %c0_48 = arith.constant 0 : index
      %144 = vector.load %arg10[%c0_47, %c0_48] : memref<128x128xf32, #tpu.memory_space<vmem>>, vector<128x128xf32>
      %cst_49 = arith.constant dense<0.000000e+00> : vector<8x128xf32>
      %145 = tpu.matmul %143, %144, %cst_49 {dimension_numbers = #tpu.dot_dimension_numbers<[1], [0], [0], [1], [0, 0, 1, 1], [], []>} : vector<8x128xf32>, vector<128x128xf32>, vector<8x128xf32> -> vector<8x128xf32>
      %c0_50 = arith.constant 0 : index
      %c0_51 = arith.constant 0 : index
      %146 = vector.load %arg11[%c0_50, %c0_51] : memref<1x128xf32, #tpu.memory_space<vmem>>, vector<1x128xf32>
      %147 = vector.broadcast %146 : vector<1x128xf32> to vector<8x128xf32>
      %148 = arith.addf %145, %147 : vector<8x128xf32>
      %149 = math.tanh %148 : vector<8x128xf32>
      %c0_52 = arith.constant 0 : index
      %c0_53 = arith.constant 0 : index
      %150 = vector.load %arg12[%c0_52, %c0_53] : memref<8x128xf32, #tpu.memory_space<vmem>>, vector<8x128xf32>
      tpu.vector_store %arg12[%c0_52, %c0_53], %149 {strides = array<i32>} : memref<8x128xf32, #tpu.memory_space<vmem>>, vector<8x128xf32>,
    } else {
    }
    return
  }
  func.func @transform_0(%arg0: i32, %arg1: i32) -> (i32, i32, i32, i32) {
    %c0_i32 = arith.constant 0 : i32
    %c0_i32_0 = arith.constant 0 : i32
    %c0_i32_1 = arith.constant 0 : i32
    return %arg0, %arg1, %c0_i32, %c0_i32_0 : i32, i32, i32, i32
  }
  func.func @transform_1(%arg0: i32, %arg1: i32) -> (i32, i32) {
    %c0_i32 = arith.constant 0 : i32
    %c0_i32_0 = arith.constant 0 : i32
    %c0_i32_1 = arith.constant 0 : i32
    return %c0_i32, %c0_i32_0 : i32, i32
  }
  func.func @transform_2(%arg0: i32, %arg1: i32) -> (i32, i32) {
    %c0_i32 = arith.constant 0 : i32
    %c0_i32_0 = arith.constant 0 : i32
    %c0_i32_1 = arith.constant 0 : i32
    return %c0_i32, %c0_i32_0 : i32, i32
  }
  func.func @transform_3(%arg0: i32, %arg1: i32) -> (i32, i32) {
    %c0_i32 = arith.constant 0 : i32
    %c0_i32_0 = arith.constant 0 : i32
    %c0_i32_1 = arith.constant 0 : i32
    return %c0_i32, %c0_i32_0 : i32, i32
  }
  func.func @transform_4(%arg0: i32, %arg1: i32) -> (i32, i32) {
    %c0_i32 = arith.constant 0 : i32
    %c0_i32_0 = arith.constant 0 : i32
    %c0_i32_1 = arith.constant 0 : i32
    return %c0_i32, %c0_i32_0 : i32, i32
  }
  func.func @transform_5(%arg0: i32, %arg1: i32) -> (i32, i32) {
    %c0_i32 = arith.constant 0 : i32
    %c0_i32_0 = arith.constant 0 : i32
    %c0_i32_1 = arith.constant 0 : i32
    return %c0_i32, %c0_i32_0 : i32, i32
  }
  func.func @transform_6(%arg0: i32, %arg1: i32) -> (i32, i32) {
    %c0_i32 = arith.constant 0 : i32
    %c0_i32_0 = arith.constant 0 : i32
    %c0_i32_1 = arith.constant 0 : i32
    return %c0_i32, %c0_i32_0 : i32, i32
  }
  func.func @transform_7(%arg0: i32, %arg1: i32) -> (i32, i32) {
    %c0_i32 = arith.constant 0 : i32
    %c0_i32_0 = arith.constant 0 : i32
    %c0_i32_1 = arith.constant 0 : i32
    return %c0_i32, %c0_i32_0 : i32, i32
  }
  func.func @transform_8(%arg0: i32, %arg1: i32) -> (i32, i32) {
    %c0_i32 = arith.constant 0 : i32
    %c0_i32_0 = arith.constant 0 : i32
    %c0_i32_1 = arith.constant 0 : i32
    return %c0_i32, %c0_i32_0 : i32, i32
  }
  func.func @transform_9(%arg0: i32, %arg1: i32) -> (i32, i32) {
    %c0_i32 = arith.constant 0 : i32
    %c0_i32_0 = arith.constant 0 : i32
    %c0_i32_1 = arith.constant 0 : i32
    return %c0_i32, %c0_i32_0 : i32, i32
  }
  func.func @transform_10(%arg0: i32, %arg1: i32) -> (i32, i32) {
    %c0_i32 = arith.constant 0 : i32
    %c0_i32_0 = arith.constant 0 : i32
    return %arg0, %c0_i32 : i32, i32
  }
}

</mosaic_0001>

<bundles_post_ra>
// kernel: tpu_custom_call.1
= control target key start
LH: loop header
LB: loop body
LE: loop exit
PB: predicated region body
PF: predicated region fallthrough
CT: control target
= control target key end

     0   :  { %s2512_s0 = inlined_call_operand.vmem [shape: f32[1,2,32,8], index: 0, kind: input, shape index: {}]   ;;  %s2513_s1 = inlined_call_operand.vmem [shape: f32[8,512], index: 1, kind: input, shape index: {}]   ;;  %s2514_s2 = inlined_call_operand.hbm [shape: f32[128,512], index: 2, kind: input, shape index: {}]   ;;  %s2515_s3 = inlined_call_operand.vmem [shape: f32[1,512], index: 3, kind: input, shape index: {}]   ;;  %s2516_s4 = inlined_call_operand.hbm [shape: f32[128,128], index: 4, kind: input, shape index: {}]   ;;  %s2517_s5 = inlined_call_operand.vmem [shape: f32[1,128], index: 5, kind: input, shape index: {}]   ;;  %s2518_s6 = inlined_call_operand.hbm [shape: f32[128,128], index: 6, kind: input, shape index: {}]   ;;  %s2519_s7 = inlined_call_operand.vmem [shape: f32[1,128], index: 7, kind: input, shape index: {}]   ;;  %s2520_s8 = inlined_call_operand.hbm [shape: f32[128,128], index: 8, kind: input, shape index: {}]   ;;  %s2521_s9 = inlined_call_operand.vmem [shape: f32[1,128], index: 9, kind: input, shape index: {}]   ;;  %s2522_s10 = inlined_call_operand.hbm [shape: f32[8,128], index: 10, kind: output, shape index: {}]  }
   0x1   :  { %2553 = sst [smem:[#allocation57_spill]] %s2516_s4 }
   0x2   :  { %15 = vsyncpa [#allocation5], 0 }
   0x3   :  { %16 = vsyncpa [#allocation8], 0 }
   0x4   :  { %17 = vsyncpa [#allocation11], 0 }
   0x5   :  { %18 = vsyncpa [#allocation6], 0  ;;  %s1940_s13 = smov 0   ;;  %s1942_s14 = smov 0  }
   0x6   :  { %s1944_s15 = smov 0  }
   0x7 LB: > { %2554 = sst [smem:[#allocation17_spill]] %s1869_s14  ;;  %s2523_s19 = sadd.s32 4294967295, %s1873_s15   ;;  %s1873_s15 = sphi %s1944_s15, %s24_s15   ;;  %s1869_s14 = sphi %s1942_s14, %s2639_s14   ;;  %s1865_s13 = sphi %s1940_s13, %s2638_s13  }
   0x8   : > { %s2555_s4 = sld [smem:[#allocation57_spill]]  ;;  %p1493_p0 = scmp.ge.s32.totalorder %s1873_s15, 1 }
   0x9   : > { %p284_p1 = scmp.lt.s32.totalorder %s1873_s15, 3  ;;  %p1963_p2 = scmp.eq.s32.totalorder %s2523_s19, 0 }
   0xa   : > { %s1875_s22 = smov [#allocation7]   ;;  %s33_s25 = sadd.s32 1, %s1869_s14 }
   0xb   : > { %p1967_p3 = pnand %p1493_p0, %p284_p1  ;;  %s317_s23 = sshll.u32 %s1875_s22, 4  ;;  %s318_s23 = int_to_ptr.vmem [resolvable:$true] %s317_s23 }
   0xc   : > { %p34_p6 = scmp.ge.s32.totalorder %s33_s25, 2  ;;  %s1876_s26 = smov 128  }
   0xd   : > { %p1561_p4 = pneg %p1967_p3  ;;  %s1877_s27 = smov 8  }
   0xe   : > { %s315_s18 = sshll.u32 %s2555_s4, 4  ;;  %s2641_s25 = smov (%p34_p6, %s33_s25), 0  ;;  %s316_s18 = int_to_ptr.hbm [resolvable:$true] %s315_s18 }
   0xf   : > { %p1975_p5 = pnand %p1963_p2, %p1561_p4  ;;  %2559 = sst [smem:[#allocation18_spill]] %s2641_s25 }
  0x10   : > { %s298_s30 = sshll.u32 %s2514_s2, 4  ;;  %s1878_s11 = smov [#allocation4]   ;;  %s299_s30 = int_to_ptr.hbm [resolvable:$true] %s298_s30 }
  0x11   : > { %1567 = dma.hbm_to_vmem [thread:$0]  (!%p1975_p5), %s316_s18, 2048, %s318_s23, [#allocation8], %s1876_s26, %s1876_s26, %s1877_s27  }
  0x12   : > { %s300_s12 = sshll.u32 %s1878_s11, 4  ;;  %s332_s22 = sshll.u32 %s2518_s6, 4  ;;  %s301_s12 = int_to_ptr.vmem [resolvable:$true] %s300_s12  ;;  %s333_s22 = int_to_ptr.hbm [resolvable:$true] %s332_s22 }
  0x13   : > { %s1879_s19 = smov 512   ;;  %s1880_s4 = smov 32  }
  0x14   : > { %1564 = dma.hbm_to_vmem [thread:$0]  (!%p1975_p5), %s299_s30, 8192, %s301_s12, [#allocation5], %s1879_s19, %s1879_s19, %s1880_s4  }
  0x15   : > { %s1881_s18 = smov [#allocation9]   ;;  %s349_s28 = sshll.u32 %s2520_s8, 4  ;;  %s350_s28 = int_to_ptr.hbm [resolvable:$true] %s349_s28 }
  0x16   : > { %s334_s23 = sshll.u32 %s1881_s18, 4  ;;  %s1882_s29 = smov [#allocation10]   ;;  %s335_s23 = int_to_ptr.vmem [resolvable:$true] %s334_s23 }
  0x17   : > { %1570 = dma.hbm_to_vmem [thread:$0]  (!%p1975_p5), %s333_s22, 2048, %s335_s23, [#allocation8], %s1876_s26, %s1876_s26, %s1877_s27  }
  0x18   : > { %s351_s11 = sshll.u32 %s1882_s29, 4  ;;  %382 = sbr.rel (%p1967_p3) target bundleno = 1209 (0x4b9), region = 60  ;;  %s352_s11 = int_to_ptr.vmem [resolvable:$true] %s351_s11 }
  0x19   : > { %1573 = dma.hbm_to_vmem [thread:$0]  (!%p1975_p5), %s350_s28, 2048, %s352_s11, [#allocation11], %s1876_s26, %s1876_s26, %s1877_s27  }
  0x1d   : > { %1848 = dma.done.wait (%p1963_p2), [#allocation5], 8192  }
  0x1e   : > { %1850 = vsyncadd (%p1963_p2), [#allocation5], 4294959104 }
  0x1f   : > { %1852 = dma.done.wait (%p1963_p2), [#allocation8], 4096  }
  0x20   : > { %1854 = vsyncadd (%p1963_p2), [#allocation8], 4294963200 }
  0x21   : > { %1856 = dma.done.wait (%p1963_p2), [#allocation11], 2048  }
  0x22   : > { %1858 = vsyncadd (%p1963_p2), [#allocation11], 4294965248  ;;  %p437_p7 = scmp.lt.s32.totalorder %s1865_s13, 1  ;;  %p1506_p8 = scmp.ne.s32.totalorder %s1865_s13, 0 }
  0x24   : > { %s438_s4 = scalar_select %p437_p7, %s1865_s13, 1 }
  0x25   : > { %447 = sbr.rel (%p1506_p8) target bundleno = 45 (0x2d), region = 80 }
  0x26   : > { %s1540_s14 = sshll.u32 %s438_s4, 5 }
  0x27   : > { %s2018_s24 = scalar_lea.vmem %s2512_s0, %s1540_s14 }
  0x2a   : > { %v1883_v0 = vmov 0.0  }
  0x2b   : > { %448 = vst [vmem:[#allocation2] sm:$0xff] %v1883_v0 }
  0x2c   : > { %449 = vst [vmem:[#allocation3] sm:$0xff] %v1883_v0 }
  0x2d PF: > { %v454_v1 = vld [vmem:[%s2513_s1] sm:$0xff]  ;;  %v455_v2 = vld [vmem:[%s2513_s1 + $0x8] sm:$0xff]  ;;  %v456_v3 = vld [vmem:[%s2513_s1 + $0x10] sm:$0xff]  ;;  %vm468_vm0 = vcmask 64512   ;;  %p1535_p9 = scmp.ne.s32.totalorder %s1865_s13, 1 }
  0x2e   : > { %496 = vmatpush.msra.mxu0 %v454_v1  ;;  %525 = vmatpush.msra.mxu1 %v455_v2  ;;  %v457_v4 = vld [vmem:[%s2513_s1 + $0x18] sm:$0xff]  ;;  %v450_v5 = vld [vmem:[%s2018_s24] sm:$0xff]  ;;  %v2034_v6 = vld [vmem:[#allocation4 + $0x1e0] sm:$0xff] }
  0x2f   : > { %554 = vmatpush.msra.mxu2 %v456_v3  ;;  %583 = vmatpush.msra.mxu3 %v457_v4  ;;  %v2036_v7 = vld [vmem:[#allocation4 + $0x1e8] sm:$0xff]  ;;  %v2040_v8 = vld [vmem:[#allocation4 + $0x1f0] sm:$0xff]  ;;  %v2042_v9 = vld [vmem:[#allocation4 + $0x1f8] sm:$0xff] }
  0x30   : > { %1507 = vmatmul.msk.f32.vlgmr.msra.gmra.mxu0 %vm468_vm0, %v450_v5  ;;  %1511 = vmatmul.msk.f32.vlgmr.msra.gmra.mxu1 %vm468_vm0, %v450_v5  ;;  %v2046_v10 = vld [vmem:[#allocation4 + $0x1c0] sm:$0xff]  ;;  %v2048_v11 = vld [vmem:[#allocation4 + $0x1c8] sm:$0xff]  ;;  %v2052_v12 = vld [vmem:[#allocation4 + $0x1d0] sm:$0xff] }
  0x31   : > { %1515 = vmatmul.msk.f32.vlgmr.msra.gmra.mxu2 %vm468_vm0, %v450_v5  ;;  %1519 = vmatmul.msk.f32.vlgmr.msra.gmra.mxu3 %vm468_vm0, %v450_v5  ;;  %v2054_v13 = vld [vmem:[#allocation4 + $0x1d8] sm:$0xff]  ;;  %v2058_v14 = vld [vmem:[#allocation4 + $0x1a0] sm:$0xff]  ;;  %v2060_v15 = vld [vmem:[#allocation4 + $0x1a8] sm:$0xff] }
  0x32   : > { %663 = vmatpush.msrb.mxu0 %v2034_v6  ;;  %683 = vmatpush.msrb.mxu1 %v2036_v7  ;;  %v2064_v16 = vld [vmem:[#allocation4 + $0x1b0] sm:$0xff]  ;;  %v2066_v17 = vld [vmem:[#allocation4 + $0x1b8] sm:$0xff]  ;;  %v2070_v18 = vld [vmem:[#allocation4 + $0x180] sm:$0xff] }
  0x33   : > { %703 = vmatpush.msrb.mxu2 %v2040_v8  ;;  %723 = vmatpush.msrb.mxu3 %v2042_v9  ;;  %v2072_v19 = vld [vmem:[#allocation4 + $0x188] sm:$0xff]  ;;  %v2076_v20 = vld [vmem:[#allocation4 + $0x190] sm:$0xff]  ;;  %v2078_v21 = vld [vmem:[#allocation4 + $0x198] sm:$0xff] }
  0x34   : > { %664 = vmatpush.msrb.mxu0 %v2046_v10  ;;  %684 = vmatpush.msrb.mxu1 %v2048_v11  ;;  %v451_v22 = vld [vmem:[%s2018_s24 + $0x8] sm:$0xff]  ;;  %v2087_v23 = vld [vmem:[#allocation4 + $0x160] sm:$0xff]  ;;  %v2089_v24 = vld [vmem:[#allocation4 + $0x168] sm:$0xff] }
  0x35   : > { %704 = vmatpush.msrb.mxu2 %v2052_v12  ;;  %724 = vmatpush.msrb.mxu3 %v2054_v13  ;;  %v2093_v25 = vld [vmem:[#allocation4 + $0x170] sm:$0xff]  ;;  %v2095_v26 = vld [vmem:[#allocation4 + $0x178] sm:$0xff]  ;;  %v2099_v27 = vld [vmem:[#allocation4 + $0x140] sm:$0xff] }
  0x36   : > { %665 = vmatpush.msrb.mxu0 %v2058_v14  ;;  %685 = vmatpush.msrb.mxu1 %v2060_v15  ;;  %v2101_v28 = vld [vmem:[#allocation4 + $0x148] sm:$0xff]  ;;  %v2105_v29 = vld [vmem:[#allocation4 + $0x150] sm:$0xff]  ;;  %v2107_v30 = vld [vmem:[#allocation4 + $0x158] sm:$0xff] }
  0x37   : > { %705 = vmatpush.msrb.mxu2 %v2064_v16  ;;  %725 = vmatpush.msrb.mxu3 %v2066_v17  ;;  %v2111_v31 = vld [vmem:[#allocation4 + $0x120] sm:$0xff]  ;;  %v2113_v32 = vld [vmem:[#allocation4 + $0x128] sm:$0xff]  ;;  %v2117_v33 = vld [vmem:[#allocation4 + $0x130] sm:$0xff] }
  0x38   : > { %666 = vmatpush.msrb.mxu0 %v2070_v18  ;;  %686 = vmatpush.msrb.mxu1 %v2072_v19  ;;  %v2119_v34 = vld [vmem:[#allocation4 + $0x138] sm:$0xff]  ;;  %v2123_v35 = vld [vmem:[#allocation4 + $0x100] sm:$0xff]  ;;  %v2125_v36 = vld [vmem:[#allocation4 + $0x108] sm:$0xff] }
  0x39   : > { %706 = vmatpush.msrb.mxu2 %v2076_v20  ;;  %726 = vmatpush.msrb.mxu3 %v2078_v21  ;;  %v2129_v37 = vld [vmem:[#allocation4 + $0x110] sm:$0xff]  ;;  %v2131_v38 = vld [vmem:[#allocation4 + $0x118] sm:$0xff]  ;;  %v452_v39 = vld [vmem:[%s2018_s24 + $0x10] sm:$0xff] }
  0x3a   : > { %1508 = vmatmul.msk.f32.gmra.mxu0 %vm468_vm0, %v451_v22  ;;  %1512 = vmatmul.msk.f32.gmra.mxu1 %vm468_vm0, %v451_v22  ;;  %v2140_v40 = vld [vmem:[#allocation4 + $0xe0] sm:$0xff]  ;;  %v2142_v41 = vld [vmem:[#allocation4 + $0xe8] sm:$0xff]  ;;  %v2146_v42 = vld [vmem:[#allocation4 + $0xf0] sm:$0xff] }
  0x3b   : > { %1516 = vmatmul.msk.f32.gmra.mxu2 %vm468_vm0, %v451_v22  ;;  %1520 = vmatmul.msk.f32.gmra.mxu3 %vm468_vm0, %v451_v22  ;;  %v2148_v43 = vld [vmem:[#allocation4 + $0xf8] sm:$0xff]  ;;  %v2152_v44 = vld [vmem:[#allocation4 + $0xc0] sm:$0xff]  ;;  %v2154_v45 = vld [vmem:[#allocation4 + $0xc8] sm:$0xff] }
  0x3c   : > { %667 = vmatpush.msrb.mxu0 %v2087_v23  ;;  %687 = vmatpush.msrb.mxu1 %v2089_v24  ;;  %v2158_v46 = vld [vmem:[#allocation4 + $0xd0] sm:$0xff]  ;;  %v2160_v47 = vld [vmem:[#allocation4 + $0xd8] sm:$0xff]  ;;  %v2164_v48 = vld [vmem:[#allocation4 + $0xa0] sm:$0xff] }
  0x3d   : > { %707 = vmatpush.msrb.mxu2 %v2093_v25  ;;  %727 = vmatpush.msrb.mxu3 %v2095_v26  ;;  %2560 = vst [vmem:[#allocation19_spill] sm:$0xff] %v2158_v46  ;;  %v2166_v49 = vld [vmem:[#allocation4 + $0xa8] sm:$0xff]  ;;  %v2170_v50 = vld [vmem:[#allocation4 + $0xb0] sm:$0xff]  ;;  %v2172_v51 = vld [vmem:[#allocation4 + $0xb8] sm:$0xff] }
  0x3e   : > { %668 = vmatpush.msrb.mxu0 %v2099_v27  ;;  %688 = vmatpush.msrb.mxu1 %v2101_v28  ;;  %2561 = vst [vmem:[#allocation20_spill] sm:$0xff] %v2160_v47  ;;  %v2176_v52 = vld [vmem:[#allocation4 + $0x80] sm:$0xff]  ;;  %v2178_v53 = vld [vmem:[#allocation4 + $0x88] sm:$0xff]  ;;  %v2182_v54 = vld [vmem:[#allocation4 + $0x90] sm:$0xff] }
  0x3f   : > { %708 = vmatpush.msrb.mxu2 %v2105_v29  ;;  %728 = vmatpush.msrb.mxu3 %v2107_v30  ;;  %2562 = vst [vmem:[#allocation21_spill] sm:$0xff] %v2164_v48  ;;  %v2184_v55 = vld [vmem:[#allocation4 + $0x98] sm:$0xff]  ;;  %v453_v56 = vld [vmem:[%s2018_s24 + $0x18] sm:$0xff]  ;;  %v2193_v57 = vld [vmem:[#allocation4 + $0x60] sm:$0xff] }
  0x40   : > { %669 = vmatpush.msrb.mxu0 %v2111_v31  ;;  %689 = vmatpush.msrb.mxu1 %v2113_v32  ;;  %2563 = vst [vmem:[#allocation22_spill] sm:$0xff] %v2166_v49  ;;  %v2195_v58 = vld [vmem:[#allocation4 + $0x68] sm:$0xff]  ;;  %v2199_v59 = vld [vmem:[#allocation4 + $0x70] sm:$0xff]  ;;  %v2201_v60 = vld [vmem:[#allocation4 + $0x78] sm:$0xff] }
  0x41   : > { %709 = vmatpush.msrb.mxu2 %v2117_v33  ;;  %729 = vmatpush.msrb.mxu3 %v2119_v34  ;;  %2564 = vst [vmem:[#allocation23_spill] sm:$0xff] %v2170_v50  ;;  %v2205_v61 = vld [vmem:[#allocation4 + $0x40] sm:$0xff]  ;;  %v2207_v62 = vld [vmem:[#allocation4 + $0x48] sm:$0xff]  ;;  %v2211_v63 = vld [vmem:[#allocation4 + $0x50] sm:$0xff] }
  0x42   : > { %670 = vmatpush.msrb.mxu0 %v2123_v35  ;;  %690 = vmatpush.msrb.mxu1 %v2125_v36  ;;  %2565 = vst [vmem:[#allocation24_spill] sm:$0xff] %v2172_v51  ;;  %v2213_v0 = vld [vmem:[#allocation4 + $0x58] sm:$0xff]  ;;  %v2217_v1 = vld [vmem:[#allocation4 + $0x20] sm:$0xff]  ;;  %v2219_v2 = vld [vmem:[#allocation4 + $0x28] sm:$0xff] }
  0x43   : > { %710 = vmatpush.msrb.mxu2 %v2129_v37  ;;  %730 = vmatpush.msrb.mxu3 %v2131_v38  ;;  %2566 = vst [vmem:[#allocation25_spill] sm:$0xff] %v2176_v52  ;;  %v2223_v3 = vld [vmem:[#allocation4 + $0x30] sm:$0xff]  ;;  %v2225_v4 = vld [vmem:[#allocation4 + $0x38] sm:$0xff]  ;;  %v2229_v5 = vld [vmem:[#allocation4] sm:$0xff] }
  0x44   : > { %1509 = vmatmul.msk.f32.gmra.mxu0 %vm468_vm0, %v452_v39  ;;  %1513 = vmatmul.msk.f32.gmra.mxu1 %vm468_vm0, %v452_v39  ;;  %2567 = vst [vmem:[#allocation26_spill] sm:$0xff] %v2178_v53  ;;  %v2231_v22 = vld [vmem:[#allocation4 + $0x8] sm:$0xff] }
  0x45   : > { %1517 = vmatmul.msk.f32.gmra.mxu2 %vm468_vm0, %v452_v39  ;;  %1521 = vmatmul.msk.f32.gmra.mxu3 %vm468_vm0, %v452_v39  ;;  %2568 = vst [vmem:[#allocation27_spill] sm:$0xff] %v2182_v54  ;;  %v2235_v39 = vld [vmem:[#allocation4 + $0x10] sm:$0xff] }
  0x46   : > { %671 = vmatpush.msrb.mxu0 %v2140_v40  ;;  %691 = vmatpush.msrb.mxu1 %v2142_v41  ;;  %2569 = vst [vmem:[#allocation28_spill] sm:$0xff] %v2184_v55 }
  0x47   : > { %711 = vmatpush.msrb.mxu2 %v2146_v42  ;;  %731 = vmatpush.msrb.mxu3 %v2148_v43  ;;  %2570 = vst [vmem:[#allocation29_spill] sm:$0xff] %v2193_v57 }
  0x48   : > { %672 = vmatpush.msrb.mxu0 %v2152_v44  ;;  %692 = vmatpush.msrb.mxu1 %v2154_v45  ;;  %2571 = vst [vmem:[#allocation30_spill] sm:$0xff] %v2195_v58 }
  0x49   : > { %712 = vmatpush.msrb.mxu2 %v2158_v46  ;;  %732 = vmatpush.msrb.mxu3 %v2160_v47  ;;  %2572 = vst [vmem:[#allocation31_spill] sm:$0xff] %v2199_v59 }
  0x4a   : > { %673 = vmatpush.msrb.mxu0 %v2164_v48  ;;  %693 = vmatpush.msrb.mxu1 %v2166_v49  ;;  %2573 = vst [vmem:[#allocation32_spill] sm:$0xff] %v2201_v60 }
  0x4b   : > { %713 = vmatpush.msrb.mxu2 %v2170_v50  ;;  %733 = vmatpush.msrb.mxu3 %v2172_v51  ;;  %2574 = vst [vmem:[#allocation33_spill] sm:$0xff] %v2205_v61 }
  0x4c   : > { %674 = vmatpush.msrb.mxu0 %v2176_v52  ;;  %694 = vmatpush.msrb.mxu1 %v2178_v53  ;;  %2575 = vst [vmem:[#allocation34_spill] sm:$0xff] %v2207_v62 }
  0x4d   : > { %714 = vmatpush.msrb.mxu2 %v2182_v54  ;;  %734 = vmatpush.msrb.mxu3 %v2184_v55  ;;  %2576 = vst [vmem:[#allocation35_spill] sm:$0xff] %v2211_v63 }
  0x4e   : > { %1510 = vmatmul.msk.f32.gmra.mxu0 %vm468_vm0, %v453_v56  ;;  %1514 = vmatmul.msk.f32.gmra.mxu1 %vm468_vm0, %v453_v56  ;;  %2577 = vst [vmem:[#allocation36_spill] sm:$0xff] %v2213_v0 }
  0x4f   : > { %1518 = vmatmul.msk.f32.gmra.mxu2 %vm468_vm0, %v453_v56  ;;  %1522 = vmatmul.msk.f32.gmra.mxu3 %vm468_vm0, %v453_v56  ;;  %2578 = vst [vmem:[#allocation37_spill] sm:$0xff] %v2217_v1  ;;  %v2237_v56 = vld [vmem:[#allocation4 + $0x18] sm:$0xff] }
  0x50   : > { %675 = vmatpush.msrb.mxu0 %v2193_v57  ;;  %695 = vmatpush.msrb.mxu1 %v2195_v58  ;;  %2579 = vst [vmem:[#allocation38_spill] sm:$0xff] %v2219_v2 }
  0x51   : > { %715 = vmatpush.msrb.mxu2 %v2199_v59  ;;  %735 = vmatpush.msrb.mxu3 %v2201_v60  ;;  %2580 = vst [vmem:[#allocation39_spill] sm:$0xff] %v2223_v3 }
  0x52   : > { %676 = vmatpush.msrb.mxu0 %v2205_v61  ;;  %696 = vmatpush.msrb.mxu1 %v2207_v62  ;;  %2581 = vst [vmem:[#allocation40_spill] sm:$0xff] %v2225_v4  ;;  %v597_v62 = vld [vmem:[#allocation2] sm:$0xff] }
  0x53   : > { %716 = vmatpush.msrb.mxu2 %v2211_v63  ;;  %736 = vmatpush.msrb.mxu3 %v2213_v0  ;;  %2582 = vst [vmem:[#allocation41_spill] sm:$0xff] %v2229_v5 }
  0x54   : > { %2583 = vst [vmem:[#allocation42_spill] sm:$0xff] %v2231_v22  ;;  %677 = vmatpush.msrb.mxu0 %v2217_v1  ;;  %697 = vmatpush.msrb.mxu1 %v2219_v2 }
  0x55   : > { %2584 = vst [vmem:[#allocation43_spill] sm:$0xff] %v2235_v39  ;;  %717 = vmatpush.msrb.mxu2 %v2223_v3  ;;  %737 = vmatpush.msrb.mxu3 %v2225_v4 }
  0x56   : > { %2585 = vst [vmem:[#allocation44_spill] sm:$0xff] %v2237_v56  ;;  %678 = vmatpush.msrb.mxu0 %v2229_v5  ;;  %698 = vmatpush.msrb.mxu1 %v2231_v22 }
  0x57   : > { %718 = vmatpush.msrb.mxu2 %v2235_v39  ;;  %738 = vmatpush.msrb.mxu3 %v2237_v56 }
  0x58   : > { %679 = vmatmul.f32.vlgmr.msrb.gmra.mxu0 %v597_v62  ;;  %699 = vmatmul.f32.vlgmr.msrb.gmra.mxu1 %v597_v62 }
  0x59   : > { %719 = vmatmul.f32.vlgmr.msrb.gmra.mxu2 %v597_v62  ;;  %739 = vmatmul.f32.vlgmr.msrb.gmra.mxu3 %v597_v62  ;;  %v2586_v62 = vld [vmem:[#allocation34_spill] sm:$0xff] }
  0x5a   : > { %810 = vmatpush.msra.mxu0 %v2034_v6  ;;  %830 = vmatpush.msra.mxu1 %v2036_v7 }
  0x5b   : > { %850 = vmatpush.msra.mxu2 %v2040_v8  ;;  %870 = vmatpush.msra.mxu3 %v2042_v9 }
  0x5c   : > { %811 = vmatpush.msra.mxu0 %v2046_v10  ;;  %831 = vmatpush.msra.mxu1 %v2048_v11 }
  0x5d   : > { %851 = vmatpush.msra.mxu2 %v2052_v12  ;;  %871 = vmatpush.msra.mxu3 %v2054_v13 }
  0x5e   : > { %812 = vmatpush.msra.mxu0 %v2058_v14  ;;  %832 = vmatpush.msra.mxu1 %v2060_v15 }
  0x5f   : > { %852 = vmatpush.msra.mxu2 %v2064_v16  ;;  %872 = vmatpush.msra.mxu3 %v2066_v17 }
  0x60   : > { %813 = vmatpush.msra.mxu0 %v2070_v18  ;;  %833 = vmatpush.msra.mxu1 %v2072_v19 }
  0x61   : > { %853 = vmatpush.msra.mxu2 %v2076_v20  ;;  %873 = vmatpush.msra.mxu3 %v2078_v21 }
  0x62   : > { %814 = vmatpush.msra.mxu0 %v2087_v23  ;;  %834 = vmatpush.msra.mxu1 %v2089_v24 }
  0x63   : > { %854 = vmatpush.msra.mxu2 %v2093_v25  ;;  %874 = vmatpush.msra.mxu3 %v2095_v26 }
  0x64   : > { %815 = vmatpush.msra.mxu0 %v2099_v27  ;;  %835 = vmatpush.msra.mxu1 %v2101_v28 }
  0x65   : > { %855 = vmatpush.msra.mxu2 %v2105_v29  ;;  %875 = vmatpush.msra.mxu3 %v2107_v30 }
  0x66   : > { %816 = vmatpush.msra.mxu0 %v2111_v31  ;;  %836 = vmatpush.msra.mxu1 %v2113_v32 }
  0x67   : > { %856 = vmatpush.msra.mxu2 %v2117_v33  ;;  %876 = vmatpush.msra.mxu3 %v2119_v34 }
  0x68   : > { %817 = vmatpush.msra.mxu0 %v2123_v35  ;;  %837 = vmatpush.msra.mxu1 %v2125_v36 }
  0x69   : > { %857 = vmatpush.msra.mxu2 %v2129_v37  ;;  %877 = vmatpush.msra.mxu3 %v2131_v38 }
  0x6a   : > { %818 = vmatpush.msra.mxu0 %v2140_v40  ;;  %838 = vmatpush.msra.mxu1 %v2142_v41 }
  0x6b   : > { %858 = vmatpush.msra.mxu2 %v2146_v42  ;;  %878 = vmatpush.msra.mxu3 %v2148_v43 }
  0x6c   : > { %819 = vmatpush.msra.mxu0 %v2152_v44  ;;  %839 = vmatpush.msra.mxu1 %v2154_v45 }
  0x6d   : > { %859 = vmatpush.msra.mxu2 %v2158_v46  ;;  %879 = vmatpush.msra.mxu3 %v2160_v47 }
  0x6e   : > { %820 = vmatpush.msra.mxu0 %v2164_v48  ;;  %840 = vmatpush.msra.mxu1 %v2166_v49 }
  0x6f   : > { %860 = vmatpush.msra.mxu2 %v2170_v50  ;;  %880 = vmatpush.msra.mxu3 %v2172_v51 }
  0x70   : > { %821 = vmatpush.msra.mxu0 %v2176_v52  ;;  %841 = vmatpush.msra.mxu1 %v2178_v53 }
  0x71   : > { %861 = vmatpush.msra.mxu2 %v2182_v54  ;;  %881 = vmatpush.msra.mxu3 %v2184_v55 }
  0x72   : > { %822 = vmatpush.msra.mxu0 %v2193_v57  ;;  %842 = vmatpush.msra.mxu1 %v2195_v58 }
  0x73   : > { %862 = vmatpush.msra.mxu2 %v2199_v59  ;;  %882 = vmatpush.msra.mxu3 %v2201_v60 }
  0x74   : > { %823 = vmatpush.msra.mxu0 %v2205_v61  ;;  %843 = vmatpush.msra.mxu1 %v2586_v62 }
  0x75   : > { %863 = vmatpush.msra.mxu2 %v2211_v63  ;;  %883 = vmatpush.msra.mxu3 %v2213_v0 }
  0x76   : > { %824 = vmatpush.msra.mxu0 %v2217_v1  ;;  %844 = vmatpush.msra.mxu1 %v2219_v2 }
  0x77   : > { %864 = vmatpush.msra.mxu2 %v2223_v3  ;;  %884 = vmatpush.msra.mxu3 %v2225_v4 }
  0x78   : > { %825 = vmatpush.msra.mxu0 %v2229_v5  ;;  %845 = vmatpush.msra.mxu1 %v2231_v22 }
  0x79   : > { %865 = vmatpush.msra.mxu2 %v2235_v39  ;;  %885 = vmatpush.msra.mxu3 %v2237_v56 }
  0x7a   : > { %957 = vmatpush.msrb.mxu0 %v2034_v6  ;;  %977 = vmatpush.msrb.mxu1 %v2036_v7 }
  0x7b   : > { %997 = vmatpush.msrb.mxu2 %v2040_v8  ;;  %1017 = vmatpush.msrb.mxu3 %v2042_v9 }
  0x7c   : > { %958 = vmatpush.msrb.mxu0 %v2046_v10  ;;  %978 = vmatpush.msrb.mxu1 %v2048_v11 }
  0x7d   : > { %998 = vmatpush.msrb.mxu2 %v2052_v12  ;;  %1018 = vmatpush.msrb.mxu3 %v2054_v13 }
  0x7e   : > { %959 = vmatpush.msrb.mxu0 %v2058_v14  ;;  %979 = vmatpush.msrb.mxu1 %v2060_v15 }
  0x7f   : > { %999 = vmatpush.msrb.mxu2 %v2064_v16  ;;  %1019 = vmatpush.msrb.mxu3 %v2066_v17 }
  0x80   : > { %960 = vmatpush.msrb.mxu0 %v2070_v18  ;;  %980 = vmatpush.msrb.mxu1 %v2072_v19 }
  0x81   : > { %1000 = vmatpush.msrb.mxu2 %v2076_v20  ;;  %1020 = vmatpush.msrb.mxu3 %v2078_v21 }
  0x82   : > { %961 = vmatpush.msrb.mxu0 %v2087_v23  ;;  %981 = vmatpush.msrb.mxu1 %v2089_v24 }
  0x83   : > { %1001 = vmatpush.msrb.mxu2 %v2093_v25  ;;  %1021 = vmatpush.msrb.mxu3 %v2095_v26 }
  0x84   : > { %962 = vmatpush.msrb.mxu0 %v2099_v27  ;;  %982 = vmatpush.msrb.mxu1 %v2101_v28 }
  0x85   : > { %1002 = vmatpush.msrb.mxu2 %v2105_v29  ;;  %1022 = vmatpush.msrb.mxu3 %v2107_v30 }
  0x86   : > { %963 = vmatpush.msrb.mxu0 %v2111_v31  ;;  %983 = vmatpush.msrb.mxu1 %v2113_v32 }
  0x87   : > { %1003 = vmatpush.msrb.mxu2 %v2117_v33  ;;  %1023 = vmatpush.msrb.mxu3 %v2119_v34 }
  0x88   : > { %964 = vmatpush.msrb.mxu0 %v2123_v35  ;;  %984 = vmatpush.msrb.mxu1 %v2125_v36 }
  0x89   : > { %1004 = vmatpush.msrb.mxu2 %v2129_v37  ;;  %1024 = vmatpush.msrb.mxu3 %v2131_v38 }
  0x8a   : > { %965 = vmatpush.msrb.mxu0 %v2140_v40  ;;  %985 = vmatpush.msrb.mxu1 %v2142_v41 }
  0x8b   : > { %1005 = vmatpush.msrb.mxu2 %v2146_v42  ;;  %1025 = vmatpush.msrb.mxu3 %v2148_v43 }
  0x8c   : > { %966 = vmatpush.msrb.mxu0 %v2152_v44  ;;  %986 = vmatpush.msrb.mxu1 %v2154_v45 }
  0x8d   : > { %1006 = vmatpush.msrb.mxu2 %v2158_v46  ;;  %1026 = vmatpush.msrb.mxu3 %v2160_v47 }
  0x8e   : > { %967 = vmatpush.msrb.mxu0 %v2164_v48  ;;  %987 = vmatpush.msrb.mxu1 %v2166_v49 }
  0x8f   : > { %1007 = vmatpush.msrb.mxu2 %v2170_v50  ;;  %1027 = vmatpush.msrb.mxu3 %v2172_v51 }
  0x90   : > { %968 = vmatpush.msrb.mxu0 %v2176_v52  ;;  %988 = vmatpush.msrb.mxu1 %v2178_v53 }
  0x91   : > { %1008 = vmatpush.msrb.mxu2 %v2182_v54  ;;  %1028 = vmatpush.msrb.mxu3 %v2184_v55 }
  0x92   : > { %969 = vmatpush.msrb.mxu0 %v2193_v57  ;;  %989 = vmatpush.msrb.mxu1 %v2195_v58 }
  0x93   : > { %1009 = vmatpush.msrb.mxu2 %v2199_v59  ;;  %1029 = vmatpush.msrb.mxu3 %v2201_v60 }
  0x94   : > { %970 = vmatpush.msrb.mxu0 %v2205_v61  ;;  %990 = vmatpush.msrb.mxu1 %v2586_v62 }
  0x95   : > { %1010 = vmatpush.msrb.mxu2 %v2211_v63  ;;  %1030 = vmatpush.msrb.mxu3 %v2213_v0 }
  0x96   : > { %971 = vmatpush.msrb.mxu0 %v2217_v1  ;;  %991 = vmatpush.msrb.mxu1 %v2219_v2  ;;  %v458_v1 = vld [vmem:[%s2515_s3] sm:$0xf] }
  0x97   : > { %1011 = vmatpush.msrb.mxu2 %v2223_v3  ;;  %1031 = vmatpush.msrb.mxu3 %v2225_v4  ;;  %v460_v61 = vperm.slane %v458_v1, 0  ;;  %v461_v3 = vperm.slane %v458_v1, 1 }
  0x98   : > { %972 = vmatpush.msrb.mxu0 %v2229_v5  ;;  %992 = vmatpush.msrb.mxu1 %v2231_v22  ;;  %v462_v22 = vperm.slane %v458_v1, 2 }
  0x99   : > { %1012 = vmatpush.msrb.mxu2 %v2235_v39  ;;  %1032 = vmatpush.msrb.mxu3 %v2237_v56  ;;  %v463_v39 = vperm.slane %v458_v1, 3 }
  0xad   : > { %v498_v62 = vpop.f32.mrf.mxu0  ;;  %v527_v63 = vpop.f32.mrf.mxu1 }
  0xb4   : > { %v556_v0 = vpop.f32.mrf.mxu2  ;;  %v585_v2 = vpop.f32.mrf.mxu3 }
  0xb5   : > { %v586_v47 = vadd.f32 %v585_v2, %v463_v39 }
  0xb7   : > { %v501_v60 = vpop.f32.mrf.mxu0  ;;  %v530_v4 = vpop.f32.mrf.mxu1 }
  0xb8   : > { %v2376_v59 = vadd.f32 %v501_v60, %v460_v61  ;;  %v2378_v5 = vadd.f32 %v530_v4, %v461_v3 }
  0xba   : > { %2587 = vst [vmem:[#allocation45_spill] sm:$0xff] %v2376_v59 }
  0xbb   : > { %2588 = vst [vmem:[#allocation46_spill] sm:$0xff] %v2378_v5 }
  0xbe   : > { %v559_v58 = vpop.f32.mrf.mxu2  ;;  %v588_v56 = vpop.f32.mrf.mxu3 }
  0xbf   : > { %v2380_v57 = vadd.f32 %v559_v58, %v462_v22  ;;  %v2382_v55 = vadd.f32 %v588_v56, %v463_v39 }
  0xc1   : > { %2589 = vst [vmem:[#allocation47_spill] sm:$0xff] %v2380_v57  ;;  %v504_v54 = vpop.f32.mrf.mxu0  ;;  %v533_v53 = vpop.f32.mrf.mxu1 }
  0xc2   : > { %2590 = vst [vmem:[#allocation48_spill] sm:$0xff] %v2382_v55  ;;  %v2384_v52 = vadd.f32 %v504_v54, %v460_v61  ;;  %v2386_v51 = vadd.f32 %v533_v53, %v461_v3  ;;  %v499_v53 = vadd.f32 %v498_v62, %v460_v61 }
  0xc4   : > { %2591 = vst [vmem:[#allocation49_spill] sm:$0xff] %v2384_v52 }
  0xc5   : > { %2592 = vst [vmem:[#allocation50_spill] sm:$0xff] %v2386_v51  ;;  %v528_v51 = vadd.f32 %v527_v63, %v461_v3 }
  0xc8   : > { %v562_v50 = vpop.f32.mrf.mxu2  ;;  %v591_v49 = vpop.f32.mrf.mxu3 }
  0xc9   : > { %v2388_v60 = vadd.f32 %v562_v50, %v462_v22  ;;  %v2390_v4 = vadd.f32 %v591_v49, %v463_v39 }
  0xcb   : > { %2593 = vst [vmem:[#allocation51_spill] sm:$0xff] %v2388_v60  ;;  %v507_v5 = vpop.f32.mrf.mxu0  ;;  %v536_v1 = vpop.f32.mrf.mxu1 }
  0xcc   : > { %2594 = vst [vmem:[#allocation52_spill] sm:$0xff] %v2390_v4  ;;  %v2392_v59 = vadd.f32 %v507_v5, %v460_v61  ;;  %v2394_v58 = vadd.f32 %v536_v1, %v461_v3  ;;  %v557_v3 = vadd.f32 %v556_v0, %v462_v22 }
  0xce   : > { %2595 = vst [vmem:[#allocation53_spill] sm:$0xff] %v2392_v59 }
  0xcf   : > { %2596 = vst [vmem:[#allocation54_spill] sm:$0xff] %v2394_v58 }
  0xd2   : > { %v565_v56 = vpop.f32.mrf.mxu2  ;;  %v594_v57 = vpop.f32.mrf.mxu3 }
  0xd3   : > { %v2396_v55 = vadd.f32 %v565_v56, %v462_v22  ;;  %v2398_v54 = vadd.f32 %v594_v57, %v463_v39 }
  0xd5   : > { %2597 = vst [vmem:[#allocation55_spill] sm:$0xff] %v2396_v55  ;;  %v680_v52 = vpop.f32.mrf.mxu0  ;;  %v700_v48 = vpop.f32.mrf.mxu1 }
  0xd6   : > { %2598 = vst [vmem:[#allocation56_spill] sm:$0xff] %v2398_v54  ;;  %v743_v50 = vadd.f32 %v680_v52, %v499_v53  ;;  %v744_v60 = vadd.f32 %v700_v48, %v528_v51 }
  0xd8   : > { %v1523_v49 = vmul.f32 -1.442695, %v743_v50  ;;  %v1524_v4 = vmul.f32 -1.442695, %v744_v60 }
  0xda   : > { %1618 = vpow2.f32 %v1523_v49 }
  0xdb   : > { %1620 = vpow2.f32 %v1524_v4 }
  0xdc   : > { %v740_v5 = vpop.f32.mrf.mxu3  ;;  %v720_v61 = vpop.f32.mrf.mxu2 }
  0xdd   : > { %v746_v1 = vadd.f32 %v740_v5, %v586_v47  ;;  %v745_v51 = vadd.f32 %v720_v61, %v557_v3 }
  0xdf   : > { %v1525_v58 = vmul.f32 -1.442695, %v746_v1 }
  0xe0   : > { %v1619_v59 = vpop.eup %1618 }
  0xe1   : > { %v1621_v46 = vpop.eup %1620  ;;  %v750_v56 = vadd.f32 1.0, %v1619_v59  ;;  %1622 = vpow2.f32 %v1525_v58 }
  0xe2   : > { %v769_v57 = vadd.f32 1.0, %v1621_v46 }
  0xe3   : > { %1624 = vrcp.f32 %v750_v56  ;;  %v762_v4 = vand.u32 2147483648, %v750_v56  ;;  %v760_v46 = vand.u32 2147483647, %v750_v56  ;;  %vm756_vm3 = vweird.f32 %v750_v56 }
  0xe4   : > { %1626 = vrcp.f32 %v769_v57  ;;  %v781_v53 = vand.u32 2147483648, %v769_v57  ;;  %v779_v50 = vand.u32 2147483647, %v769_v57  ;;  %vm775_vm4 = vweird.f32 %v769_v57 }
  0xe5   : > { %v763_v22 = vor.u32 1.1754944e-38, %v762_v4  ;;  %vm761_vm7 = vcmp.eq.f32.partialorder %v760_v46, 8.507059e+37 }
  0xe6   : > { %v782_v61 = vor.u32 1.1754944e-38, %v781_v53  ;;  %vm780_vm8 = vcmp.eq.f32.partialorder %v779_v50, 8.507059e+37 }
  0xe7   : > { %v1623_v63 = vpop.eup %1622 }
  0xe8   : > { %v789_v52 = vadd.f32 1.0, %v1623_v63  ;;  %v598_v63 = vld [vmem:[#allocation3] sm:$0xff] }
  0xe9   : > { %v1625_v48 = vpop.eup %1624 }
  0xea   : > { %v1627_v62 = vpop.eup %1626  ;;  %v752_v60 = vmul.f32 %v1625_v48, %v750_v56  ;;  %1628 = vrcp.f32 %v789_v52  ;;  %vm757_vm1 = vweird.f32 %v1625_v48  ;;  %v801_v4 = vand.u32 2147483648, %v789_v52 }
  0xeb   : > { %v771_v2 = vmul.f32 %v1627_v62, %v769_v57  ;;  %1630 = vtanh.f32 %v745_v51  ;;  %vm776_vm2 = vweird.f32 %v1627_v62  ;;  %vm758_vm5 = vmor %vm756_vm3, %vm757_vm1  ;;  %vm795_vm10 = vweird.f32 %v789_v52 }
  0xec   : > { %v753_v39 = vsub.f32 1.0, %v752_v60  ;;  %vm777_vm6 = vmor %vm775_vm4, %vm776_vm2  ;;  %v799_v53 = vand.u32 2147483647, %v789_v52  ;;  %v802_v46 = vor.u32 1.1754944e-38, %v801_v4 }
  0xed   : > { %v772_v47 = vsub.f32 1.0, %v771_v2 }
  0xee   : > { %v754_v59 = vmul.f32 %v1625_v48, %v753_v39  ;;  %vm800_vm12 = vcmp.eq.f32.partialorder %v799_v53, 8.507059e+37 }
  0xef   : > { %v773_v58 = vmul.f32 %v1627_v62, %v772_v47 }
  0xf0   : > { %v1629_v49 = vpop.eup %1628  ;;  %v755_v0 = vadd.f32 %v1625_v48, %v754_v59 }
  0xf1   : > { %v774_v5 = vadd.f32 %v1627_v62, %v773_v58  ;;  %v791_v1 = vmul.f32 %v1629_v49, %v789_v52  ;;  %v1631_v51 = vpop.eup %1630  ;;  %vm796_vm9 = vweird.f32 %v1629_v49 }
  0xf2   : > { %v759_v3 = vsel %vm758_vm5, %v1625_v48, %v755_v0  ;;  %vm797_vm11 = vmor %vm795_vm10, %vm796_vm9 }
  0xf3   : > { %v764_v60 = vsel %vm761_vm7, %v763_v22, %v759_v3  ;;  %v778_v2 = vsel %vm777_vm6, %v1627_v62, %v774_v5  ;;  %v792_v39 = vsub.f32 1.0, %v791_v1 }
  0xf4   : > { %v783_v47 = vsel %vm780_vm8, %v782_v61, %v778_v2  ;;  %v806_v55 = vmul.f32 %v1631_v51, %v764_v60  ;;  %v2628_v61 = vld [vmem:[#allocation47_spill] sm:$0xff] }
  0xf5   : > { %v805_v54 = vmul.f32 %v783_v47, %v598_v63  ;;  %v793_v59 = vmul.f32 %v1629_v49, %v792_v39 }
  0xf7   : > { %v2400_v56 = vadd.f32 %v806_v55, %v805_v54  ;;  %v794_v57 = vadd.f32 %v1629_v49, %v793_v59 }
  0xf9   : > { %1632 = vtanh.f32 %v2400_v56  ;;  %v798_v48 = vsel %vm797_vm11, %v1629_v49, %v794_v57 }
  0xfa   : > { %v803_v58 = vsel %vm800_vm12, %v802_v46, %v798_v48 }
  0xff   : > { %v1633_v62 = vpop.eup %1632 }
 0x100   : > { %v809_v50 = vmul.f32 %v1633_v62, %v803_v58 }
 0x102   : > { %826 = vmatmul.f32.vlgmr.msra.gmra.mxu0 %v809_v50  ;;  %846 = vmatmul.f32.vlgmr.msra.gmra.mxu1 %v809_v50 }
 0x103   : > { %866 = vmatmul.f32.vlgmr.msra.gmra.mxu2 %v809_v50  ;;  %886 = vmatmul.f32.vlgmr.msra.gmra.mxu3 %v809_v50 }
 0x104   : > { %1104 = vmatpush.msra.mxu0 %v2034_v6  ;;  %1124 = vmatpush.msra.mxu1 %v2036_v7  ;;  %v2599_v6 = vld [vmem:[#allocation19_spill] sm:$0xff]  ;;  %v2600_v7 = vld [vmem:[#allocation20_spill] sm:$0xff] }
 0x105   : > { %1144 = vmatpush.msra.mxu2 %v2040_v8  ;;  %1164 = vmatpush.msra.mxu3 %v2042_v9  ;;  %v2601_v8 = vld [vmem:[#allocation21_spill] sm:$0xff]  ;;  %v2602_v9 = vld [vmem:[#allocation22_spill] sm:$0xff] }
 0x106   : > { %1105 = vmatpush.msra.mxu0 %v2046_v10  ;;  %1125 = vmatpush.msra.mxu1 %v2048_v11  ;;  %v2603_v10 = vld [vmem:[#allocation23_spill] sm:$0xff]  ;;  %v2604_v11 = vld [vmem:[#allocation24_spill] sm:$0xff] }
 0x107   : > { %1145 = vmatpush.msra.mxu2 %v2052_v12  ;;  %1165 = vmatpush.msra.mxu3 %v2054_v13  ;;  %v2605_v12 = vld [vmem:[#allocation25_spill] sm:$0xff]  ;;  %v2606_v13 = vld [vmem:[#allocation26_spill] sm:$0xff] }
 0x108   : > { %1106 = vmatpush.msra.mxu0 %v2058_v14  ;;  %1126 = vmatpush.msra.mxu1 %v2060_v15  ;;  %v2607_v14 = vld [vmem:[#allocation27_spill] sm:$0xff]  ;;  %v2608_v15 = vld [vmem:[#allocation28_spill] sm:$0xff] }
 0x109   : > { %1146 = vmatpush.msra.mxu2 %v2064_v16  ;;  %1166 = vmatpush.msra.mxu3 %v2066_v17  ;;  %v2609_v16 = vld [vmem:[#allocation29_spill] sm:$0xff]  ;;  %v2610_v17 = vld [vmem:[#allocation30_spill] sm:$0xff] }
 0x10a   : > { %1107 = vmatpush.msra.mxu0 %v2070_v18  ;;  %1127 = vmatpush.msra.mxu1 %v2072_v19  ;;  %v2611_v18 = vld [vmem:[#allocation31_spill] sm:$0xff]  ;;  %v2612_v19 = vld [vmem:[#allocation32_spill] sm:$0xff] }
 0x10b   : > { %1147 = vmatpush.msra.mxu2 %v2076_v20  ;;  %1167 = vmatpush.msra.mxu3 %v2078_v21  ;;  %v2613_v20 = vld [vmem:[#allocation33_spill] sm:$0xff]  ;;  %v2614_v21 = vld [vmem:[#allocation34_spill] sm:$0xff] }
 0x10c   : > { %1108 = vmatpush.msra.mxu0 %v2087_v23  ;;  %1128 = vmatpush.msra.mxu1 %v2089_v24  ;;  %v2615_v23 = vld [vmem:[#allocation35_spill] sm:$0xff]  ;;  %v2616_v24 = vld [vmem:[#allocation36_spill] sm:$0xff] }
 0x10d   : > { %1148 = vmatpush.msra.mxu2 %v2093_v25  ;;  %1168 = vmatpush.msra.mxu3 %v2095_v26  ;;  %v2617_v25 = vld [vmem:[#allocation37_spill] sm:$0xff]  ;;  %v2618_v26 = vld [vmem:[#allocation38_spill] sm:$0xff] }
 0x10e   : > { %1109 = vmatpush.msra.mxu0 %v2099_v27  ;;  %1129 = vmatpush.msra.mxu1 %v2101_v28  ;;  %v2619_v27 = vld [vmem:[#allocation39_spill] sm:$0xff]  ;;  %v2620_v28 = vld [vmem:[#allocation40_spill] sm:$0xff] }
 0x10f   : > { %1149 = vmatpush.msra.mxu2 %v2105_v29  ;;  %1169 = vmatpush.msra.mxu3 %v2107_v30  ;;  %v2621_v29 = vld [vmem:[#allocation41_spill] sm:$0xff]  ;;  %v2622_v30 = vld [vmem:[#allocation42_spill] sm:$0xff] }
 0x110   : > { %1110 = vmatpush.msra.mxu0 %v2111_v31  ;;  %1130 = vmatpush.msra.mxu1 %v2113_v32  ;;  %v2623_v31 = vld [vmem:[#allocation43_spill] sm:$0xff]  ;;  %v2624_v32 = vld [vmem:[#allocation44_spill] sm:$0xff] }
 0x111   : > { %1150 = vmatpush.msra.mxu2 %v2117_v33  ;;  %1170 = vmatpush.msra.mxu3 %v2119_v34 }
 0x112   : > { %1111 = vmatpush.msra.mxu0 %v2123_v35  ;;  %1131 = vmatpush.msra.mxu1 %v2125_v36  ;;  %v2625_v35 = vld [vmem:[#allocation45_spill] sm:$0xff] }
 0x113   : > { %1151 = vmatpush.msra.mxu2 %v2129_v37  ;;  %1171 = vmatpush.msra.mxu3 %v2131_v38  ;;  %v2626_v37 = vld [vmem:[#allocation46_spill] sm:$0xff] }
 0x114   : > { %1112 = vmatpush.msra.mxu0 %v2140_v40  ;;  %1132 = vmatpush.msra.mxu1 %v2142_v41 }
 0x115   : > { %1152 = vmatpush.msra.mxu2 %v2146_v42  ;;  %1172 = vmatpush.msra.mxu3 %v2148_v43  ;;  %v2627_v43 = vld [vmem:[#allocation48_spill] sm:$0xff] }
 0x116   : > { %1113 = vmatpush.msra.mxu0 %v2152_v44  ;;  %1133 = vmatpush.msra.mxu1 %v2154_v45 }
 0x117   : > { %1153 = vmatpush.msra.mxu2 %v2599_v6  ;;  %1173 = vmatpush.msra.mxu3 %v2600_v7 }
 0x118   : > { %1114 = vmatpush.msra.mxu0 %v2601_v8  ;;  %1134 = vmatpush.msra.mxu1 %v2602_v9 }
 0x119   : > { %1154 = vmatpush.msra.mxu2 %v2603_v10  ;;  %1174 = vmatpush.msra.mxu3 %v2604_v11 }
 0x11a   : > { %1115 = vmatpush.msra.mxu0 %v2605_v12  ;;  %1135 = vmatpush.msra.mxu1 %v2606_v13 }
 0x11b   : > { %1155 = vmatpush.msra.mxu2 %v2607_v14  ;;  %1175 = vmatpush.msra.mxu3 %v2608_v15 }
 0x11c   : > { %1116 = vmatpush.msra.mxu0 %v2609_v16  ;;  %1136 = vmatpush.msra.mxu1 %v2610_v17 }
 0x11d   : > { %1156 = vmatpush.msra.mxu2 %v2611_v18  ;;  %1176 = vmatpush.msra.mxu3 %v2612_v19 }
 0x11e   : > { %1117 = vmatpush.msra.mxu0 %v2613_v20  ;;  %1137 = vmatpush.msra.mxu1 %v2614_v21 }
 0x11f   : > { %1157 = vmatpush.msra.mxu2 %v2615_v23  ;;  %1177 = vmatpush.msra.mxu3 %v2616_v24 }
 0x120   : > { %1118 = vmatpush.msra.mxu0 %v2617_v25  ;;  %1138 = vmatpush.msra.mxu1 %v2618_v26 }
 0x121   : > { %1158 = vmatpush.msra.mxu2 %v2619_v27  ;;  %1178 = vmatpush.msra.mxu3 %v2620_v28  ;;  %v2629_v28 = vld [vmem:[#allocation49_spill] sm:$0xff] }
 0x122   : > { %1119 = vmatpush.msra.mxu0 %v2621_v29  ;;  %1139 = vmatpush.msra.mxu1 %v2622_v30  ;;  %v2630_v30 = vld [vmem:[#allocation50_spill] sm:$0xff] }
 0x123   : > { %1159 = vmatpush.msra.mxu2 %v2623_v31  ;;  %1179 = vmatpush.msra.mxu3 %v2624_v32 }
 0x17f   : > { %v827_v33 = vpop.f32.mrf.mxu0  ;;  %v847_v34 = vpop.f32.mrf.mxu1 }
 0x180   : > { %v890_v36 = vadd.f32 %v827_v33, %v2625_v35  ;;  %v891_v38 = vadd.f32 %v847_v34, %v2626_v37  ;;  %v2631_v35 = vld [vmem:[#allocation52_spill] sm:$0xff] }
 0x182   : > { %v1526_v40 = vmul.f32 -1.442695, %v890_v36  ;;  %v1527_v41 = vmul.f32 -1.442695, %v891_v38 }
 0x184   : > { %1634 = vpow2.f32 %v1526_v40 }
 0x185   : > { %1636 = vpow2.f32 %v1527_v41 }
 0x186   : > { %v887_v42 = vpop.f32.mrf.mxu3  ;;  %v867_v0 = vpop.f32.mrf.mxu2 }
 0x187   : > { %v893_v44 = vadd.f32 %v887_v42, %v2627_v43  ;;  %v892_v63 = vadd.f32 %v867_v0, %v2628_v61 }
 0x189   : > { %v1528_v45 = vmul.f32 -1.442695, %v893_v44 }
 0x18a   : > { %v1635_v55 = vpop.eup %1634 }
 0x18b   : > { %v1637_v54 = vpop.eup %1636  ;;  %v897_v52 = vadd.f32 1.0, %v1635_v55  ;;  %1638 = vpow2.f32 %v1528_v45 }
 0x18c   : > { %v916_v49 = vadd.f32 1.0, %v1637_v54  ;;  %v2632_v54 = vld [vmem:[#allocation51_spill] sm:$0xff] }
 0x18d   : > { %1640 = vrcp.f32 %v897_v52  ;;  %v909_v47 = vand.u32 2147483648, %v897_v52  ;;  %v907_v4 = vand.u32 2147483647, %v897_v52  ;;  %vm903_vm15 = vweird.f32 %v897_v52 }
 0x18e   : > { %1642 = vrcp.f32 %v916_v49  ;;  %v928_v59 = vand.u32 2147483648, %v916_v49  ;;  %v926_v48 = vand.u32 2147483647, %v916_v49  ;;  %vm922_vm0 = vweird.f32 %v916_v49 }
 0x18f   : > { %v910_v58 = vor.u32 1.1754944e-38, %v909_v47  ;;  %vm908_vm3 = vcmp.eq.f32.partialorder %v907_v4, 8.507059e+37 }
 0x190   : > { %v929_v7 = vor.u32 1.1754944e-38, %v928_v59  ;;  %vm927_vm4 = vcmp.eq.f32.partialorder %v926_v48, 8.507059e+37 }
 0x191   : > { %v1639_v22 = vpop.eup %1638 }
 0x192   : > { %v936_v5 = vadd.f32 1.0, %v1639_v22 }
 0x193   : > { %v1641_v1 = vpop.eup %1640 }
 0x194   : > { %v1643_v3 = vpop.eup %1642  ;;  %v899_v51 = vmul.f32 %v1641_v1, %v897_v52  ;;  %1644 = vrcp.f32 %v936_v5  ;;  %vm904_vm13 = vweird.f32 %v1641_v1  ;;  %v948_v19 = vand.u32 2147483648, %v936_v5 }
 0x195   : > { %v918_v60 = vmul.f32 %v1643_v3, %v916_v49  ;;  %1646 = vtanh.f32 %v892_v63  ;;  %vm923_vm14 = vweird.f32 %v1643_v3  ;;  %vm905_vm1 = vmor %vm903_vm15, %vm904_vm13  ;;  %vm942_vm6 = vweird.f32 %v936_v5 }
 0x196   : > { %v900_v2 = vsub.f32 1.0, %v899_v51  ;;  %vm924_vm2 = vmor %vm922_vm0, %vm923_vm14  ;;  %v946_v20 = vand.u32 2147483647, %v936_v5  ;;  %v949_v23 = vor.u32 1.1754944e-38, %v948_v19 }
 0x197   : > { %v919_v39 = vsub.f32 1.0, %v918_v60 }
 0x198   : > { %v901_v57 = vmul.f32 %v1641_v1, %v900_v2  ;;  %vm947_vm8 = vcmp.eq.f32.partialorder %v946_v20, 8.507059e+37 }
 0x199   : > { %v920_v53 = vmul.f32 %v1643_v3, %v919_v39 }
 0x19a   : > { %v1645_v46 = vpop.eup %1644  ;;  %v902_v62 = vadd.f32 %v1641_v1, %v901_v57 }
 0x19b   : > { %v921_v50 = vadd.f32 %v1643_v3, %v920_v53  ;;  %v938_v6 = vmul.f32 %v1645_v46, %v936_v5  ;;  %v1647_v9 = vpop.eup %1646  ;;  %vm943_vm5 = vweird.f32 %v1645_v46 }
 0x19c   : > { %v906_v8 = vsel %vm905_vm1, %v1641_v1, %v902_v62  ;;  %vm944_vm7 = vmor %vm942_vm6, %vm943_vm5 }
 0x19d   : > { %v911_v10 = vsel %vm908_vm3, %v910_v58, %v906_v8  ;;  %v925_v11 = vsel %vm924_vm2, %v1643_v3, %v921_v50  ;;  %v939_v12 = vsub.f32 1.0, %v938_v6 }
 0x19e   : > { %v930_v13 = vsel %vm927_vm4, %v929_v7, %v925_v11  ;;  %v953_v14 = vmul.f32 %v1647_v9, %v911_v10 }
 0x19f   : > { %v952_v15 = vmul.f32 %v930_v13, %v2400_v56  ;;  %v940_v16 = vmul.f32 %v1645_v46, %v939_v12 }
 0x1a1   : > { %v2472_v17 = vadd.f32 %v953_v14, %v952_v15  ;;  %v941_v18 = vadd.f32 %v1645_v46, %v940_v16 }
 0x1a3   : > { %1648 = vtanh.f32 %v2472_v17  ;;  %v945_v21 = vsel %vm944_vm7, %v1645_v46, %v941_v18 }
 0x1a4   : > { %v950_v25 = vsel %vm947_vm8, %v949_v23, %v945_v21  ;;  %v2633_v21 = vld [vmem:[#allocation53_spill] sm:$0xff] }
 0x1a9   : > { %v1649_v24 = vpop.eup %1648 }
 0x1aa   : > { %v956_v26 = vmul.f32 %v1649_v24, %v950_v25  ;;  %v2634_v24 = vld [vmem:[#allocation54_spill] sm:$0xff] }
 0x1ac   : > { %973 = vmatmul.f32.vlgmr.msrb.gmra.mxu0 %v956_v26  ;;  %993 = vmatmul.f32.vlgmr.msrb.gmra.mxu1 %v956_v26 }
 0x1ad   : > { %1013 = vmatmul.f32.vlgmr.msrb.gmra.mxu2 %v956_v26  ;;  %1033 = vmatmul.f32.vlgmr.msrb.gmra.mxu3 %v956_v26 }
 0x229   : > { %v974_v56 = vpop.f32.mrf.mxu0  ;;  %v994_v27 = vpop.f32.mrf.mxu1 }
 0x22a   : > { %v1037_v29 = vadd.f32 %v974_v56, %v2629_v28  ;;  %v1038_v31 = vadd.f32 %v994_v27, %v2630_v30  ;;  %v2635_v28 = vld [vmem:[#allocation56_spill] sm:$0xff] }
 0x22c   : > { %v1529_v32 = vmul.f32 -1.442695, %v1037_v29  ;;  %v1530_v33 = vmul.f32 -1.442695, %v1038_v31 }
 0x22e   : > { %1650 = vpow2.f32 %v1529_v32 }
 0x22f   : > { %1652 = vpow2.f32 %v1530_v33 }
 0x230   : > { %v1034_v34 = vpop.f32.mrf.mxu3  ;;  %v1014_v43 = vpop.f32.mrf.mxu2 }
 0x231   : > { %v1040_v36 = vadd.f32 %v1034_v34, %v2631_v35  ;;  %v1039_v52 = vadd.f32 %v1014_v43, %v2632_v54 }
 0x233   : > { %v1531_v37 = vmul.f32 -1.442695, %v1040_v36 }
 0x234   : > { %v1651_v38 = vpop.eup %1650 }
 0x235   : > { %v1653_v40 = vpop.eup %1652  ;;  %v1044_v41 = vadd.f32 1.0, %v1651_v38  ;;  %1654 = vpow2.f32 %v1531_v37 }
 0x236   : > { %v1063_v42 = vadd.f32 1.0, %v1653_v40  ;;  %v2636_v40 = vld [vmem:[#allocation55_spill] sm:$0xff] }
 0x237   : > { %1656 = vrcp.f32 %v1044_v41  ;;  %v1056_v61 = vand.u32 2147483648, %v1044_v41  ;;  %v1054_v51 = vand.u32 2147483647, %v1044_v41  ;;  %vm1050_vm11 = vweird.f32 %v1044_v41 }
 0x238   : > { %1658 = vrcp.f32 %v1063_v42  ;;  %v1075_v63 = vand.u32 2147483648, %v1063_v42  ;;  %v1073_v2 = vand.u32 2147483647, %v1063_v42  ;;  %vm1069_vm12 = vweird.f32 %v1063_v42 }
 0x239   : > { %v1057_v59 = vor.u32 1.1754944e-38, %v1056_v61  ;;  %vm1055_vm15 = vcmp.eq.f32.partialorder %v1054_v51, 8.507059e+37 }
 0x23a   : > { %v1076_v53 = vor.u32 1.1754944e-38, %v1075_v63  ;;  %vm1074_vm0 = vcmp.eq.f32.partialorder %v1073_v2, 8.507059e+37 }
 0x23b   : > { %v1655_v44 = vpop.eup %1654 }
 0x23c   : > { %v1083_v45 = vadd.f32 1.0, %v1655_v44 }
 0x23d   : > { %v1657_v55 = vpop.eup %1656 }
 0x23e   : > { %v1659_v49 = vpop.eup %1658  ;;  %v1046_v0 = vmul.f32 %v1657_v55, %v1044_v41  ;;  %1660 = vrcp.f32 %v1083_v45  ;;  %vm1051_vm9 = vweird.f32 %v1657_v55  ;;  %v1095_v12 = vand.u32 2147483648, %v1083_v45 }
 0x23f   : > { %v1065_v22 = vmul.f32 %v1659_v49, %v1063_v42  ;;  %1662 = vtanh.f32 %v1039_v52  ;;  %vm1070_vm10 = vweird.f32 %v1659_v49  ;;  %vm1052_vm13 = vmor %vm1050_vm11, %vm1051_vm9  ;;  %vm1089_vm2 = vweird.f32 %v1083_v45 }
 0x240   : > { %v1047_v5 = vsub.f32 1.0, %v1046_v0  ;;  %vm1071_vm14 = vmor %vm1069_vm12, %vm1070_vm10  ;;  %v1093_v13 = vand.u32 2147483647, %v1083_v45  ;;  %v1096_v15 = vor.u32 1.1754944e-38, %v1095_v12 }
 0x241   : > { %v1066_v1 = vsub.f32 1.0, %v1065_v22 }
 0x242   : > { %v1048_v3 = vmul.f32 %v1657_v55, %v1047_v5  ;;  %vm1094_vm4 = vcmp.eq.f32.partialorder %v1093_v13, 8.507059e+37 }
 0x243   : > { %v1067_v60 = vmul.f32 %v1659_v49, %v1066_v1 }
 0x244   : > { %v1661_v39 = vpop.eup %1660  ;;  %v1049_v47 = vadd.f32 %v1657_v55, %v1048_v3 }
 0x245   : > { %v1068_v57 = vadd.f32 %v1659_v49, %v1067_v60  ;;  %v1085_v4 = vmul.f32 %v1661_v39, %v1083_v45  ;;  %v1663_v46 = vpop.eup %1662  ;;  %vm1090_vm1 = vweird.f32 %v1661_v39 }
 0x246   : > { %v1053_v48 = vsel %vm1052_vm13, %v1657_v55, %v1049_v47  ;;  %vm1091_vm3 = vmor %vm1089_vm2, %vm1090_vm1 }
 0x247   : > { %v1058_v62 = vsel %vm1055_vm15, %v1057_v59, %v1053_v48  ;;  %v1072_v58 = vsel %vm1071_vm14, %v1659_v49, %v1068_v57  ;;  %v1086_v50 = vsub.f32 1.0, %v1085_v4 }
 0x248   : > { %v1077_v6 = vsel %vm1074_vm0, %v1076_v53, %v1072_v58  ;;  %v1100_v7 = vmul.f32 %v1663_v46, %v1058_v62 }
 0x249   : > { %v1099_v8 = vmul.f32 %v1077_v6, %v2472_v17  ;;  %v1087_v9 = vmul.f32 %v1661_v39, %v1086_v50 }
 0x24b   : > { %v2480_v10 = vadd.f32 %v1100_v7, %v1099_v8  ;;  %v1088_v11 = vadd.f32 %v1661_v39, %v1087_v9 }
 0x24d   : > { %1664 = vtanh.f32 %v2480_v10  ;;  %v1092_v14 = vsel %vm1091_vm3, %v1661_v39, %v1088_v11 }
 0x24e   : > { %v1097_v18 = vsel %vm1094_vm4, %v1096_v15, %v1092_v14 }
 0x253   : > { %v1665_v16 = vpop.eup %1664 }
 0x254   : > { %v1103_v19 = vmul.f32 %v1665_v16, %v1097_v18 }
 0x256   : > { %1120 = vmatmul.f32.vlgmr.msra.gmra.mxu0 %v1103_v19  ;;  %1140 = vmatmul.f32.vlgmr.msra.gmra.mxu1 %v1103_v19 }
 0x257   : > { %1160 = vmatmul.f32.vlgmr.msra.gmra.mxu2 %v1103_v19  ;;  %1180 = vmatmul.f32.vlgmr.msra.gmra.mxu3 %v1103_v19 }
 0x2d3   : > { %v1121_v17 = vpop.f32.mrf.mxu0  ;;  %v1141_v20 = vpop.f32.mrf.mxu1 }
 0x2d4   : > { %v1184_v23 = vadd.f32 %v1121_v17, %v2633_v21  ;;  %v1185_v25 = vadd.f32 %v1141_v20, %v2634_v24 }
 0x2d6   : > { %v1532_v26 = vmul.f32 -1.442695, %v1184_v23  ;;  %v1533_v56 = vmul.f32 -1.442695, %v1185_v25 }
 0x2d8   : > { %1666 = vpow2.f32 %v1532_v26 }
 0x2d9   : > { %1668 = vpow2.f32 %v1533_v56 }
 0x2da   : > { %v1181_v27 = vpop.f32.mrf.mxu3  ;;  %v1161_v35 = vpop.f32.mrf.mxu2 }
 0x2db   : > { %v1187_v29 = vadd.f32 %v1181_v27, %v2635_v28  ;;  %v1186_v41 = vadd.f32 %v1161_v35, %v2636_v40 }
 0x2dd   : > { %v1534_v30 = vmul.f32 -1.442695, %v1187_v29 }
 0x2de   : > { %v1667_v31 = vpop.eup %1666 }
 0x2df   : > { %v1669_v32 = vpop.eup %1668  ;;  %v1191_v33 = vadd.f32 1.0, %v1667_v31  ;;  %1670 = vpow2.f32 %v1534_v30 }
 0x2e0   : > { %v1210_v34 = vadd.f32 1.0, %v1669_v32 }
 0x2e1   : > { %1672 = vrcp.f32 %v1191_v33  ;;  %v1203_v54 = vand.u32 2147483648, %v1191_v33  ;;  %v1201_v0 = vand.u32 2147483647, %v1191_v33  ;;  %vm1197_vm7 = vweird.f32 %v1191_v33 }
 0x2e2   : > { %1674 = vrcp.f32 %v1210_v34  ;;  %v1222_v52 = vand.u32 2147483648, %v1210_v34  ;;  %v1220_v5 = vand.u32 2147483647, %v1210_v34  ;;  %vm1216_vm8 = vweird.f32 %v1210_v34 }
 0x2e3   : > { %v1204_v63 = vor.u32 1.1754944e-38, %v1203_v54  ;;  %vm1202_vm11 = vcmp.eq.f32.partialorder %v1201_v0, 8.507059e+37 }
 0x2e4   : > { %v1223_v60 = vor.u32 1.1754944e-38, %v1222_v52  ;;  %vm1221_vm12 = vcmp.eq.f32.partialorder %v1220_v5, 8.507059e+37 }
 0x2e5   : > { %v1671_v36 = vpop.eup %1670 }
 0x2e6   : > { %v1230_v37 = vadd.f32 1.0, %v1671_v36 }
 0x2e7   : > { %v1673_v38 = vpop.eup %1672 }
 0x2e8   : > { %v1675_v42 = vpop.eup %1674  ;;  %v1193_v43 = vmul.f32 %v1673_v38, %v1191_v33  ;;  %1676 = vrcp.f32 %v1230_v37  ;;  %vm1198_vm5 = vweird.f32 %v1673_v38  ;;  %v1242_v50 = vand.u32 2147483648, %v1230_v37 }
 0x2e9   : > { %v1212_v44 = vmul.f32 %v1675_v42, %v1210_v34  ;;  %1678 = vtanh.f32 %v1186_v41  ;;  %vm1217_vm6 = vweird.f32 %v1675_v42  ;;  %vm1199_vm9 = vmor %vm1197_vm7, %vm1198_vm5  ;;  %vm1236_vm14 = vweird.f32 %v1230_v37 }
 0x2ea   : > { %v1194_v45 = vsub.f32 1.0, %v1193_v43  ;;  %vm1218_vm10 = vmor %vm1216_vm8, %vm1217_vm6  ;;  %v1240_v6 = vand.u32 2147483647, %v1230_v37  ;;  %v1243_v8 = vor.u32 1.1754944e-38, %v1242_v50 }
 0x2eb   : > { %v1213_v55 = vsub.f32 1.0, %v1212_v44 }
 0x2ec   : > { %v1195_v49 = vmul.f32 %v1673_v38, %v1194_v45  ;;  %vm1241_vm0 = vcmp.eq.f32.partialorder %v1240_v6, 8.507059e+37 }
 0x2ed   : > { %v1214_v22 = vmul.f32 %v1675_v42, %v1213_v55 }
 0x2ee   : > { %v1677_v1 = vpop.eup %1676  ;;  %v1196_v61 = vadd.f32 %v1673_v38, %v1195_v49 }
 0x2ef   : > { %v1215_v3 = vadd.f32 %v1675_v42, %v1214_v22  ;;  %v1232_v51 = vmul.f32 %v1677_v1, %v1230_v37  ;;  %v1679_v39 = vpop.eup %1678  ;;  %vm1237_vm13 = vweird.f32 %v1677_v1 }
 0x2f0   : > { %v1200_v2 = vsel %vm1199_vm9, %v1673_v38, %v1196_v61  ;;  %vm1238_vm15 = vmor %vm1236_vm14, %vm1237_vm13 }
 0x2f1   : > { %v1205_v47 = vsel %vm1202_vm11, %v1204_v63, %v1200_v2  ;;  %v1219_v59 = vsel %vm1218_vm10, %v1675_v42, %v1215_v3  ;;  %v1233_v57 = vsub.f32 1.0, %v1232_v51 }
 0x2f2   : > { %v1224_v4 = vsel %vm1221_vm12, %v1223_v60, %v1219_v59  ;;  %v1247_v53 = vmul.f32 %v1679_v39, %v1205_v47 }
 0x2f3   : > { %v1246_v48 = vmul.f32 %v1224_v4, %v2480_v10  ;;  %v1234_v46 = vmul.f32 %v1677_v1, %v1233_v57 }
 0x2f5   : > { %v1248_v62 = vadd.f32 %v1247_v53, %v1246_v48  ;;  %v1235_v58 = vadd.f32 %v1677_v1, %v1234_v46 }
 0x2f7   : > { %1680 = vtanh.f32 %v1248_v62  ;;  %1252 = vst [vmem:[#allocation3] sm:$0xff] %v1248_v62  ;;  %v1239_v7 = vsel %vm1238_vm15, %v1677_v1, %v1235_v58 }
 0x2f8   : > { %v1244_v11 = vsel %vm1241_vm0, %v1243_v8, %v1239_v7 }
 0x2fc   : > { %1256 = sbr.rel (%p1535_p9) target bundleno = 1203 (0x4b3), region = 84 }
 0x2fd   : > { %v1681_v9 = vpop.eup %1680 }
 0x2fe   : > { %v1250_v12 = vmul.f32 %v1681_v9, %v1244_v11 }
 0x300   : > { %1251 = vst [vmem:[#allocation2] sm:$0xff] %v1250_v12 }
 0x301   : > { %v1272_v10 = vld [vmem:[#allocation7 + $0x78] sm:$0xff]  ;;  %v1271_v13 = vld [vmem:[#allocation7 + $0x70] sm:$0xff]  ;;  %v1270_v14 = vld [vmem:[#allocation7 + $0x68] sm:$0xff] }
 0x302   : > { %1277 = vmatpush.msra.mxu0 %v1272_v10  ;;  %v1269_v15 = vld [vmem:[#allocation7 + $0x60] sm:$0xff]  ;;  %v1313_v16 = vld [vmem:[#allocation9 + $0x78] sm:$0xff]  ;;  %v1312_v18 = vld [vmem:[#allocation9 + $0x70] sm:$0xff] }
 0x303   : > { %v1268_v19 = vld [vmem:[#allocation7 + $0x58] sm:$0xff]  ;;  %1318 = vmatpush.msra.mxu1 %v1313_v16  ;;  %v1311_v17 = vld [vmem:[#allocation9 + $0x68] sm:$0xff]  ;;  %v1267_v20 = vld [vmem:[#allocation7 + $0x50] sm:$0xff] }
 0x304   : > { %1278 = vmatpush.msra.mxu0 %v1271_v13  ;;  %v1310_v21 = vld [vmem:[#allocation9 + $0x60] sm:$0xff]  ;;  %v1266_v23 = vld [vmem:[#allocation7 + $0x48] sm:$0xff]  ;;  %v1309_v24 = vld [vmem:[#allocation9 + $0x58] sm:$0xff] }
 0x305   : > { %1319 = vmatpush.msra.mxu1 %v1312_v18  ;;  %v1265_v25 = vld [vmem:[#allocation7 + $0x40] sm:$0xff]  ;;  %v1308_v26 = vld [vmem:[#allocation9 + $0x50] sm:$0xff]  ;;  %v1264_v56 = vld [vmem:[#allocation7 + $0x38] sm:$0xff] }
 0x306   : > { %1279 = vmatpush.msra.mxu0 %v1270_v14  ;;  %v1307_v27 = vld [vmem:[#allocation9 + $0x48] sm:$0xff]  ;;  %v1263_v28 = vld [vmem:[#allocation7 + $0x30] sm:$0xff]  ;;  %v1306_v29 = vld [vmem:[#allocation9 + $0x40] sm:$0xff] }
 0x307   : > { %1320 = vmatpush.msra.mxu1 %v1311_v17  ;;  %v1262_v30 = vld [vmem:[#allocation7 + $0x28] sm:$0xff]  ;;  %v1305_v31 = vld [vmem:[#allocation9 + $0x38] sm:$0xff]  ;;  %v1261_v32 = vld [vmem:[#allocation7 + $0x20] sm:$0xff] }
 0x308   : > { %1280 = vmatpush.msra.mxu0 %v1269_v15  ;;  %v1304_v33 = vld [vmem:[#allocation9 + $0x30] sm:$0xff]  ;;  %v1260_v34 = vld [vmem:[#allocation7 + $0x18] sm:$0xff]  ;;  %v1303_v35 = vld [vmem:[#allocation9 + $0x28] sm:$0xff] }
 0x309   : > { %1321 = vmatpush.msra.mxu1 %v1310_v21  ;;  %v1259_v36 = vld [vmem:[#allocation7 + $0x10] sm:$0xff]  ;;  %v1302_v37 = vld [vmem:[#allocation9 + $0x20] sm:$0xff]  ;;  %v1258_v38 = vld [vmem:[#allocation7 + $0x8] sm:$0xff] }
 0x30a   : > { %1281 = vmatpush.msra.mxu0 %v1268_v19  ;;  %v1301_v40 = vld [vmem:[#allocation9 + $0x18] sm:$0xff]  ;;  %v1257_v41 = vld [vmem:[#allocation7] sm:$0xff]  ;;  %v1300_v42 = vld [vmem:[#allocation9 + $0x10] sm:$0xff] }
 0x30b   : > { %1322 = vmatpush.msra.mxu1 %v1309_v24  ;;  %v1299_v43 = vld [vmem:[#allocation9 + $0x8] sm:$0xff]  ;;  %v1298_v44 = vld [vmem:[#allocation9] sm:$0xff]  ;;  %v1354_v45 = vld [vmem:[#allocation10 + $0x78] sm:$0xff] }
 0x30c   : > { %1282 = vmatpush.msra.mxu0 %v1267_v20  ;;  %v1353_v55 = vld [vmem:[#allocation10 + $0x70] sm:$0xff]  ;;  %1359 = vmatpush.msra.mxu2 %v1354_v45  ;;  %v1352_v54 = vld [vmem:[#allocation10 + $0x68] sm:$0xff]  ;;  %v1351_v52 = vld [vmem:[#allocation10 + $0x60] sm:$0xff] }
 0x30d   : > { %1323 = vmatpush.msra.mxu1 %v1308_v26  ;;  %v1350_v49 = vld [vmem:[#allocation10 + $0x58] sm:$0xff]  ;;  %v1349_v0 = vld [vmem:[#allocation10 + $0x50] sm:$0xff]  ;;  %v1348_v22 = vld [vmem:[#allocation10 + $0x48] sm:$0xff] }
 0x30e   : > { %1283 = vmatpush.msra.mxu0 %v1266_v23  ;;  %1360 = vmatpush.msra.mxu2 %v1353_v55  ;;  %v1347_v5 = vld [vmem:[#allocation10 + $0x40] sm:$0xff]  ;;  %v1346_v1 = vld [vmem:[#allocation10 + $0x38] sm:$0xff]  ;;  %v1345_v61 = vld [vmem:[#allocation10 + $0x30] sm:$0xff] }
 0x30f   : > { %1324 = vmatpush.msra.mxu1 %v1307_v27  ;;  %v1344_v63 = vld [vmem:[#allocation10 + $0x28] sm:$0xff]  ;;  %v1343_v3 = vld [vmem:[#allocation10 + $0x20] sm:$0xff]  ;;  %v1342_v51 = vld [vmem:[#allocation10 + $0x18] sm:$0xff] }
 0x310   : > { %1284 = vmatpush.msra.mxu0 %v1265_v25  ;;  %1361 = vmatpush.msra.mxu2 %v1352_v54  ;;  %v1682_v60 = vld [vmem:[%s2517_s5] ss:$0 sm:$0xff]  ;;  %v1340_v57 = vld [vmem:[#allocation10 + $0x8] sm:$0xff]  ;;  %v1339_v4 = vld [vmem:[#allocation10] sm:$0xff] }
 0x311   : > { %1325 = vmatpush.msra.mxu1 %v1306_v29  ;;  %v1341_v59 = vld [vmem:[#allocation10 + $0x10] sm:$0xff] }
 0x312   : > { %1285 = vmatpush.msra.mxu0 %v1264_v56  ;;  %1362 = vmatpush.msra.mxu2 %v1351_v52  ;;  %v1683_v53 = vld [vmem:[%s2519_s7] ss:$0 sm:$0xff] }
 0x313   : > { %1326 = vmatpush.msra.mxu1 %v1305_v31  ;;  %v1684_v58 = vld [vmem:[%s2521_s9] ss:$0 sm:$0xff] }
 0x314   : > { %1286 = vmatpush.msra.mxu0 %v1263_v28  ;;  %1363 = vmatpush.msra.mxu2 %v1350_v49 }
 0x315   : > { %1327 = vmatpush.msra.mxu1 %v1304_v33 }
 0x316   : > { %1287 = vmatpush.msra.mxu0 %v1262_v30  ;;  %1364 = vmatpush.msra.mxu2 %v1349_v0 }
 0x317   : > { %1328 = vmatpush.msra.mxu1 %v1303_v35 }
 0x318   : > { %1288 = vmatpush.msra.mxu0 %v1261_v32  ;;  %1365 = vmatpush.msra.mxu2 %v1348_v22 }
 0x319   : > { %1329 = vmatpush.msra.mxu1 %v1302_v37 }
 0x31a   : > { %1289 = vmatpush.msra.mxu0 %v1260_v34  ;;  %1366 = vmatpush.msra.mxu2 %v1347_v5 }
 0x31b   : > { %1330 = vmatpush.msra.mxu1 %v1301_v40 }
 0x31c   : > { %1290 = vmatpush.msra.mxu0 %v1259_v36  ;;  %1367 = vmatpush.msra.mxu2 %v1346_v1 }
 0x31d   : > { %1331 = vmatpush.msra.mxu1 %v1300_v42 }
 0x31e   : > { %1291 = vmatpush.msra.mxu0 %v1258_v38  ;;  %1368 = vmatpush.msra.mxu2 %v1345_v61 }
 0x31f   : > { %1332 = vmatpush.msra.mxu1 %v1299_v43 }
 0x320   : > { %1292 = vmatpush.msra.mxu0 %v1257_v41  ;;  %1369 = vmatpush.msra.mxu2 %v1344_v63 }
 0x321   : > { %1293 = vmatmul.f32.vlgmr.msra.gmra.mxu0 %v1250_v12  ;;  %1333 = vmatpush.msra.mxu1 %v1298_v44 }
 0x322   : > { %1370 = vmatpush.msra.mxu2 %v1343_v3 }
 0x324   : > { %1371 = vmatpush.msra.mxu2 %v1342_v51 }
 0x326   : > { %1372 = vmatpush.msra.mxu2 %v1341_v59 }
 0x328   : > { %1373 = vmatpush.msra.mxu2 %v1340_v57 }
 0x32a   : > { %1374 = vmatpush.msra.mxu2 %v1339_v4 }
 0x39e   : > { %v1294_v2 = vpop.f32.mrf.mxu0 }
 0x39f   : > { %v1295_v39 = vadd.f32 %v1682_v60, %v1294_v2 }
 0x3a1   : > { %v1297_v47 = vmax.f32 %v1295_v39, 0.0 }
 0x3a3   : > { %1334 = vmatmul.f32.vlgmr.msra.gmra.mxu1 %v1297_v47 }
 0x420   : > { %v1335_v48 = vpop.f32.mrf.mxu1 }
 0x421   : > { %v1336_v46 = vadd.f32 %v1683_v53, %v1335_v48 }
 0x423   : > { %v1338_v62 = vmax.f32 %v1336_v46, 0.0 }
 0x425   : > { %1375 = vmatmul.f32.vlgmr.msra.gmra.mxu2 %v1338_v62 }
 0x4a8   : > { %v1376_v50 = vpop.f32.mrf.mxu2 }
 0x4a9   : > { %v1377_v6 = vadd.f32 %v1684_v58, %v1376_v50 }
 0x4ab   : > { %1685 = vtanh.f32 %v1377_v6 }
 0x4b1   : > { %v1686_v7 = vpop.eup %1685 }
 0x4b2   : > { %1380 = vst [vmem:[#allocation12] sm:$0xff] %v1686_v7 }
 0x4b3 PF: > { %s2637_s14 = sadd.s32 4294967295, %s1873_s15   ;;  %s1391_s24 = sshll.u32 %s2522_s10, 4  ;;  %s1392_s24 = int_to_ptr.hbm [resolvable:$true] %s1391_s24 }
 0x4b4   : > { %p1582_p10 = scmp.eq.s32.totalorder %s2637_s14, 1  ;;  %s1884_s25 = smov [#allocation12]  }
 0x4b5   : > { %s1389_s20 = sshll.u32 %s1884_s25, 4  ;;  %s1390_s20 = int_to_ptr.vmem [resolvable:$true] %s1389_s20 }
 0x4b6   : > { %1558 = dma.vmem_to_hbm [thread:$0]  (%p1582_p10), %s1390_s20, 128, %s1392_s24, [#allocation6]  }
 0x4b7   : > { %1860 = dma.done.wait (%p1582_p10), [#allocation6], 128  }
 0x4b8   : > { %1862 = vsyncadd (%p1582_p10), [#allocation6], 4294967168 }
 0x4b9 PF: > { %s24_s15 = sadd.s32 1, %s1873_s15   ;;  %s2638_s13 = sld [smem:[#allocation17_spill]] }
 0x4ba   : > { %p21_p11 = scmp.ge.s32.totalorder %s24_s15, 4   ;;  %s2639_s14 = sld [smem:[#allocation18_spill]] }
 0x4bc   :  { %23 = sbr.rel (!%p21_p11) target bundleno = 7 (0x7), region = 113 }
 0x4c1   :  { %1405 = vsyncpa [#allocation5], 1 }
 0x4c2   :  { %1407 = vsyncpa [#allocation5 + $0x1], 1 }
 0x4c3   :  { %1408 = vsyncpa [#allocation8], 1 }
 0x4c4   :  { %1409 = vsyncpa [#allocation11], 1 }
 0x4c5   :  { %1410 = vsyncpa [#allocation6], 1 }
 0x4c6   :  { %1412 = vsyncpa [#allocation6 + $0x1], 1 }

</bundles_post_ra>
